<compile_context>
chip_gen: v7x
topology: tpu7x:2x2x1
jax: 0.10.0
libtpu: 0.0.40
codegen_flags: <defaults>
</compile_context>

<pallas_src>
import numpy as np
import jax
import jax.numpy as jnp
from jax.experimental import pallas as pl
from jax.experimental.pallas import tpu as pltpu

EMBED_DIM = 32                               # embedding_dim
USE_BF16_MATMULS = False                     # v6e/v7x MXU win; breaks 1e-5 tol
_MEMBER_VMEM_BUDGET = 12 * 1024 * 1024       # double-buffered member block cap


# ----------------------------- kernel helpers --------------------------------

def _mm(a, b):
    """MXU matmul with optional bf16 operands and f32 accumulation."""
    if USE_BF16_MATMULS:
        a = a.astype(jnp.bfloat16)
        b = b.astype(jnp.bfloat16)
    return jnp.dot(a, b, preferred_element_type=jnp.float32)


def _masked_softmax_members(logits, valid):
    """Softmax over the member (sublane) axis 0 of a (M, TB) tile."""
    z = jnp.where(valid, logits, -jnp.inf)
    m = jnp.max(z, axis=0, keepdims=True)
    e = jnp.where(valid, jnp.exp(z - m), 0.0)
    return e / jnp.sum(e, axis=0, keepdims=True)


# ----------------------------- kernels ----------------------------------------

def _gradi_group_kernel(menb_ref, grp_ref, itm_ref, cnt_ref,
                        wa1mT_ref, wa1gT_ref, ba1_ref, wa2_ref,
                        wmT_ref, bm_ref,
                        wp1T_ref, bp1_ref, wp2_ref,
                        bp2_ref,
                        out_ref):
    M, D, TB = menb_ref.shape
    menb = menb_ref[...]                                   # (M, D, TB)
    grp = grp_ref[...]                                     # (D, TB)
    itm = itm_ref[...]                                     # (D, TB)

    # validity mask built in-kernel from member counts (clamped >= 1 so the
    # softmax denominator can never be zero).
    counts = jnp.maximum(cnt_ref[...], 1)                  # (1, TB) int32
    miota = jax.lax.broadcasted_iota(jnp.int32, (M, TB), 0)
    valid = miota < counts                                 # (M, TB) bool

    # --- AttentionLayer: Linear(2D,16) -> ReLU -> Linear(16,1) -> softmax(M)
    # concat([menb, grp]) @ wa1 is split; the group half is computed once.
    wa1mT = wa1mT_ref[...]                                 # (16, D)
    wa2 = wa2_ref[...]                                     # (16, 1)
    h_g = _mm(wa1gT_ref[...], grp) + ba1_ref[...]          # (16, TB)
    att_rows = []
    for m in range(M):
        h = jnp.maximum(_mm(wa1mT, menb[m]) + h_g, 0.0)    # (16, TB)
        # 16 -> 1 projection on the VPU (sublane reduce), not an N=1 matmul.
        att_rows.append(jnp.sum(h * wa2, axis=0, keepdims=True))   # (1, TB)
    att = jnp.concatenate(att_rows, axis=0)                # (M, TB)
    # ba2 is one scalar added to every logit -> cancels in the softmax.
    weight = _masked_softmax_members(att, valid)           # (M, TB)

    # group-specific member embeddings (grp broadcast inline)
    gro_specif = menb + weight[:, None, :] * grp[None, :, :]        # (M, D, TB)

    # --- shared MLP Linear(D,D) + ReLU, then scaled dot-product vs the item
    wmT = wmT_ref[...]                                     # (D, D)
    bm = bm_ref[...]                                       # (D, 1)
    item_jd = jnp.maximum(_mm(wmT, itm) + bm, 0.0)         # (D, TB)
    inv_sqrt_d = np.float32(1.0 / np.sqrt(D))
    sa_rows = []
    for m in range(M):
        mk = jnp.maximum(_mm(wmT, gro_specif[m]) + bm, 0.0)         # (D, TB)
        sa_rows.append(jnp.sum(mk * item_jd, axis=0, keepdims=True)
                       * inv_sqrt_d)                       # (1, TB)
    sa = jnp.concatenate(sa_rows, axis=0)                  # (M, TB)
    w_item = _masked_softmax_members(sa, valid)            # (M, TB)

    g_emb = jnp.sum(w_item[:, None, :] * gro_specif, axis=0)        # (D, TB)

    # --- PredictLayer on [g*i; g; i]: one fused (8, 3D) @ (3D, TB) matmul
    x3 = jnp.concatenate([g_emb * itm, g_emb, itm], axis=0)         # (3D, TB)
    p1 = jnp.maximum(_mm(wp1T_ref[...], x3) + bp1_ref[...], 0.0)    # (8, TB)
    # 8 -> 1 projection on the VPU; bp2 is a scalar read from SMEM.
    p = jnp.sum(p1 * wp2_ref[...], axis=0, keepdims=True) + bp2_ref[0, 0]
    out_ref[...] = 1.0 / (1.0 + jnp.exp(-p))               # sigmoid, (1, TB)


def _gradi_user_kernel(u_ref, i_ref,
                       wp1T_ref, bp1_ref, wp2_ref, bp2_ref, out_ref):
    u = u_ref[...]                                         # (D, TB)
    it = i_ref[...]                                        # (D, TB)
    x3 = jnp.concatenate([u * it, u, it], axis=0)          # (3D, TB)
    p1 = jnp.maximum(_mm(wp1T_ref[...], x3) + bp1_ref[...], 0.0)    # (8, TB)
    p = jnp.sum(p1 * wp2_ref[...], axis=0, keepdims=True) + bp2_ref[0, 0]
    out_ref[...] = 1.0 / (1.0 + jnp.exp(-p))


# ----------------------------- wrapper ----------------------------------------

def _round_up(x, m):
    return ((x + m - 1) // m) * m


def _choose_tiles(batch, n_members):
    """Pick (b_pad, tb): lane-axis tile in {128,256,512,1024}, bounded so the
    double-buffered member block fits the VMEM budget (v7x only has 64 MiB),
    preferring >= 2 grid steps (v7x megacore) and minimal padding waste."""
    row_bytes = 2 * max(1, n_members) * EMBED_DIM * 4      # dbl-buffered B/row
    tb_cap = max(128, min(1024, (_MEMBER_VMEM_BUDGET // row_bytes) // 128 * 128))
    if batch <= 128:
        return 128, 128
    best_key, best = None, None
    for tb in (128, 256, 512, 1024):
        if tb > tb_cap:
            continue
        b_pad = _round_up(batch, tb)
        key = (0 if b_pad // tb >= 2 else 1, b_pad - batch, -tb)
        if best_key is None or key < best_key:
            best_key, best = key, (b_pad, tb)
    return best


def _batched_spec(block_shape):
    nd = len(block_shape)
    return pl.BlockSpec(block_shape, lambda i, _nd=nd: (0,) * (_nd - 1) + (i,))


def _const_spec(arr):
    nd = arr.ndim
    return pl.BlockSpec(arr.shape, lambda i, _nd=nd: (0,) * _nd)


_SMEM_SPEC = pl.BlockSpec(memory_space=pltpu.MemorySpace.SMEM)


def _build_member_tensors(user_inputs, group_member_dict, num_users, b_pad):
    member_lists = [group_member_dict[int(g)] for g in np.asarray(user_inputs)]
    max_m = max(max(len(m) for m in member_lists), 1)
    menb_ids = np.full((b_pad, max_m), num_users - 1, dtype=np.int32)
    # padded batch rows keep counts == max_m (all "valid") so their softmax
    # stays finite; their outputs are sliced away in the wrapper.
    counts = np.full((b_pad,), max_m, dtype=np.int32)
    for i, mem in enumerate(member_lists):
        menb_ids[i, :len(mem)] = np.asarray(mem, dtype=np.int32)
        counts[i] = max(len(mem), 1)
    return menb_ids, counts


def gradi_forward(params, user_inputs, item_inputs, type_m,
                  group_member_dict, num_users):
    user_inputs = np.asarray(user_inputs)
    item_inputs = np.asarray(item_inputs)
    B = int(user_inputs.shape[0])
    d = EMBED_DIM

    # Transposed / split weights (one-time prep; kernels see W^T blocks).
    wa1 = params['wa1']
    wa1mT, wa1gT = wa1[:d].T, wa1[d:].T                    # (16, D) each
    ba1c = params['ba1'].reshape(16, 1)
    wa2c = params['wa2'].reshape(16, 1)
    wmT = params['wm'].T                                   # (D, D)
    bmc = params['bm'].reshape(d, 1)
    wp1T = params['wp1'].T                                 # (8, 3D)
    bp1c = params['bp1'].reshape(8, 1)
    wp2c = params['wp2'].reshape(8, 1)
    bp2s = params['bp2'].reshape(1, 1)                     # SMEM scalar

    compiler_params = pltpu.CompilerParams(
        dimension_semantics=("parallel",),
        vmem_limit_bytes=32 * 1024 * 1024)

    if type_m == 'group':
        member_lists = [group_member_dict[int(g)] for g in user_inputs]
        max_m = max(max(len(m) for m in member_lists), 1)
        b_pad, tb = _choose_tiles(B, max_m)
        n_tiles = b_pad // tb

        item_ids = np.zeros(b_pad, np.int32); item_ids[:B] = item_inputs
        grp_ids = np.zeros(b_pad, np.int32); grp_ids[:B] = user_inputs
        menb_ids, counts = _build_member_tensors(user_inputs, group_member_dict,
                                                 num_users, b_pad)

        itm_t = params['itemembeds'][item_ids].T           # (D, b_pad)
        grp_t = params['groupembeds'][grp_ids].T           # (D, b_pad)
        # TODO(synk): fuse this gather (+ transpose) into the kernel via
        #             scalar-prefetched ids and manual row DMAs.
        menb_t = jnp.transpose(params['userembeds'][jnp.asarray(menb_ids)],
                               (1, 2, 0))                  # (M, D, b_pad)
        cnt = jnp.asarray(counts).reshape(1, b_pad)        # (1, b_pad) int32

        vmem_weights = (wa1mT, wa1gT, ba1c, wa2c, wmT, bmc, wp1T, bp1c, wp2c)
        out = pl.pallas_call(
            _gradi_group_kernel,
            out_shape=jax.ShapeDtypeStruct((1, b_pad), jnp.float32),
            grid=(n_tiles,),
            in_specs=[_batched_spec((max_m, d, tb)),
                      _batched_spec((d, tb)),
                      _batched_spec((d, tb)),
                      _batched_spec((1, tb))]
                     + [_const_spec(w) for w in vmem_weights]
                     + [_SMEM_SPEC],
            out_specs=_batched_spec((1, tb)),
            compiler_params=compiler_params,
        )(menb_t, grp_t, itm_t, cnt, *vmem_weights, bp2s)
        return out[0, :B][:, None]

    elif type_m == 'user':
        b_pad, tb = _choose_tiles(B, 1)
        n_tiles = b_pad // tb
        u_ids = np.zeros(b_pad, np.int32); u_ids[:B] = user_inputs
        i_ids = np.zeros(b_pad, np.int32); i_ids[:B] = item_inputs
        u_t = params['userembeds'][u_ids].T                # (D, b_pad)
        i_t = params['itemembeds'][i_ids].T                # (D, b_pad)

        vmem_weights = (wp1T, bp1c, wp2c)
        out = pl.pallas_call(
            _gradi_user_kernel,
            out_shape=jax.ShapeDtypeStruct((1, b_pad), jnp.float32),
            grid=(n_tiles,),
            in_specs=[_batched_spec((d, tb)), _batched_spec((d, tb))]
                     + [_const_spec(w) for w in vmem_weights]
                     + [_SMEM_SPEC],
            out_specs=_batched_spec((1, tb)),
            compiler_params=compiler_params,
        )(u_t, i_t, *vmem_weights, bp2s)
        return out[0, :B][:, None]

    else:
        raise ValueError(type_m)


# -------------------------- deterministic params ------------------------------

def init_params(key, num_users, num_items, num_groups, d):
    ks = jax.random.split(key, 12)

    def nrm(k, shape, scale=0.1):
        return (scale * jax.random.normal(k, shape)).astype(jnp.float32)

    # Weights stored as (in, out); PyTorch Linear uses (out, in) with x @ W.T,
    # which is equivalent for a synthetic (deterministic) init.
    return dict(
        userembeds=nrm(ks[0], (num_users, d)),
        itemembeds=nrm(ks[1], (num_items, d)),
        groupembeds=nrm(ks[2], (num_groups, d)),
        wa1=nrm(ks[3], (2 * d, 16)), ba1=nrm(ks[4], (1, 16)),
        wa2=nrm(ks[5], (16, 1)), ba2=nrm(ks[6], (1, 1)),
        wm=nrm(ks[7], (d, d)), bm=jnp.zeros((1, d), jnp.float32),  # mlp bias=0
        wp1=nrm(ks[8], (3 * d, 8)), bp1=nrm(ks[9], (1, 8)),
        wp2=nrm(ks[10], (8, 1)), bp2=nrm(ks[11], (1, 1)),
    )


# ----------------------------- pure-JAX reference -----------------------------

def _reference_group(params, user_inputs, item_inputs, group_member_dict,
                     num_users):
    user_inputs = np.asarray(user_inputs)
    item_inputs = np.asarray(item_inputs)
    B = int(user_inputs.shape[0])
    itm = params['itemembeds'][item_inputs]
    grp = params['groupembeds'][user_inputs]
    menb_ids, counts = _build_member_tensors(user_inputs, group_member_dict,
                                             num_users, B)
    menb = params['userembeds'][jnp.asarray(menb_ids)]      # (B, M, D)
    M, D = menb.shape[1], menb.shape[2]
    mask = jnp.where(np.arange(M)[None, :] < counts[:, None], 0.0, -jnp.inf)
    grp_b = jnp.broadcast_to(grp[:, None, :], (B, M, D))
    gro_mem = jnp.concatenate([menb, grp_b], axis=-1)
    h = jnp.maximum(gro_mem @ params['wa1'] + params['ba1'][0], 0.0)
    att = (h @ params['wa2'] + params['ba2'][0])[..., 0]
    weight = jax.nn.softmax(att + mask, axis=1)
    gro_specif = menb + weight[:, :, None] * grp_b
    men_kdl = jnp.maximum(gro_specif @ params['wm'] + params['bm'][0], 0.0)
    item_jd = jnp.maximum(itm @ params['wm'] + params['bm'][0], 0.0)
    sa = jnp.einsum('bmd,bd->bm', men_kdl, item_jd) / jnp.sqrt(jnp.float32(D))
    w_item = jax.nn.softmax(sa + mask, axis=1)
    g_emb = jnp.einsum('bm,bmd->bd', w_item, gro_specif)
    new_e = jnp.concatenate([g_emb * itm, g_emb, itm], axis=-1)
    p1 = jnp.maximum(new_e @ params['wp1'] + params['bp1'][0], 0.0)
    return jax.nn.sigmoid(p1 @ params['wp2'] + params['bp2'][0])


def _reference_user(params, user_inputs, item_inputs):
    u = params['userembeds'][np.asarray(user_inputs)]
    it = params['itemembeds'][np.asarray(item_inputs)]
    new_e = jnp.concatenate([u * it, u, it], axis=-1)
    p1 = jnp.maximum(new_e @ params['wp1'] + params['bp1'][0], 0.0)
    return jax.nn.sigmoid(p1 @ params['wp2'] + params['bp2'][0])


# ----------------------------- main -------------------------------------------

if __name__ == "__main__":
    key = jax.random.PRNGKey(0)
    num_users, num_items, num_groups, d = 10, 12, 5, EMBED_DIM
    # group -> member-user ids (last user id, num_users-1, is the pad user)
    group_member_dict = {0: [1, 2, 3], 1: [4, 5], 2: [0, 6, 7, 8]}

    params = init_params(key, num_users, num_items, num_groups, d)

    # 'group' mode: user_inputs are group ids
    group_inputs = np.array([0, 1, 2], dtype=np.int32)
    item_inputs = np.array([3, 7, 5], dtype=np.int32)
    preds_group = gradi_forward(params, group_inputs, item_inputs, 'group',
                                group_member_dict, num_users)
    jax.block_until_ready(preds_group)

    # 'user' mode
    u_in = np.array([1, 4], dtype=np.int32)
    i_in = np.array([2, 9], dtype=np.int32)
    preds_user = gradi_forward(params, u_in, i_in, 'user',
                               group_member_dict, num_users)
    jax.block_until_ready(preds_user)

    ref_g = _reference_group(params, group_inputs, item_inputs,
                             group_member_dict, num_users)
    ref_u = _reference_user(params, u_in, i_in)
    assert preds_group.shape == (3, 1) and preds_user.shape == (2, 1)
    assert np.allclose(np.asarray(preds_group), np.asarray(ref_g),
                       atol=1e-5, rtol=1e-5)
    assert np.allclose(np.asarray(preds_user), np.asarray(ref_u),
                       atol=1e-5, rtol=1e-5)
    print("KERNEL_OK")
</pallas_src>

<mosaic_0001>
module attributes {stable_mosaic.version = 11 : i64} {
  func.func @_gradi_group_kernel(%arg0: i32, %arg1: memref<4x32x128xf32, #tpu.memory_space<vmem>>, %arg2: memref<32x128xf32, #tpu.memory_space<vmem>>, %arg3: memref<32x128xf32, #tpu.memory_space<vmem>>, %arg4: memref<1x128xi32, #tpu.memory_space<vmem>>, %arg5: memref<16x32xf32, #tpu.memory_space<vmem>>, %arg6: memref<16x32xf32, #tpu.memory_space<vmem>>, %arg7: memref<16x1xf32, #tpu.memory_space<vmem>>, %arg8: memref<16x1xf32, #tpu.memory_space<vmem>>, %arg9: memref<32x32xf32, #tpu.memory_space<vmem>>, %arg10: memref<32x1xf32, #tpu.memory_space<vmem>>, %arg11: memref<8x96xf32, #tpu.memory_space<vmem>>, %arg12: memref<8x1xf32, #tpu.memory_space<vmem>>, %arg13: memref<8x1xf32, #tpu.memory_space<vmem>>, %arg14: memref<1x1xf32, #tpu.memory_space<smem>>, %arg15: memref<1x128xf32, #tpu.memory_space<vmem>>) attributes {dimension_semantics = [#tpu.dimension_semantics<parallel>], iteration_bounds = array<i64: 1>, scalar_prefetch = 0 : i64, scratch_operands = 0 : i64, tpu.core_type = #tpu.core_type<tc>, window_params = [{transform_indices = @transform_0, window_bounds = array<i64: 4, 32, 128>}, {transform_indices = @transform_1, window_bounds = array<i64: 32, 128>}, {transform_indices = @transform_2, window_bounds = array<i64: 32, 128>}, {transform_indices = @transform_3, window_bounds = array<i64: 1, 128>}, {pipeline_mode = #tpu.pipeline_mode<synchronous>, transform_indices = @transform_4, window_bounds = array<i64: 16, 32>}, {pipeline_mode = #tpu.pipeline_mode<synchronous>, transform_indices = @transform_5, window_bounds = array<i64: 16, 32>}, {pipeline_mode = #tpu.pipeline_mode<synchronous>, transform_indices = @transform_6, window_bounds = array<i64: 16, 1>}, {pipeline_mode = #tpu.pipeline_mode<synchronous>, transform_indices = @transform_7, window_bounds = array<i64: 16, 1>}, {pipeline_mode = #tpu.pipeline_mode<synchronous>, transform_indices = @transform_8, window_bounds = array<i64: 32, 32>}, {pipeline_mode = #tpu.pipeline_mode<synchronous>, transform_indices = @transform_9, window_bounds = array<i64: 32, 1>}, {pipeline_mode = #tpu.pipeline_mode<synchronous>, transform_indices = @transform_10, window_bounds = array<i64: 8, 96>}, {pipeline_mode = #tpu.pipeline_mode<synchronous>, transform_indices = @transform_11, window_bounds = array<i64: 8, 1>}, {pipeline_mode = #tpu.pipeline_mode<synchronous>, transform_indices = @transform_12, window_bounds = array<i64: 8, 1>}, {transform_indices = @transform_13, window_bounds = array<i64: 1, 1>}, {transform_indices = @transform_14, window_bounds = array<i64: 1, 128>}]} {
    %c0 = arith.constant 0 : index
    %c0_0 = arith.constant 0 : index
    %c0_1 = arith.constant 0 : index
    %0 = vector.load %arg1[%c0, %c0_0, %c0_1] : memref<4x32x128xf32, #tpu.memory_space<vmem>>, vector<4x32x128xf32>
    %c0_2 = arith.constant 0 : index
    %c0_3 = arith.constant 0 : index
    %1 = vector.load %arg2[%c0_2, %c0_3] : memref<32x128xf32, #tpu.memory_space<vmem>>, vector<32x128xf32>
    %c0_4 = arith.constant 0 : index
    %c0_5 = arith.constant 0 : index
    %2 = vector.load %arg3[%c0_4, %c0_5] : memref<32x128xf32, #tpu.memory_space<vmem>>, vector<32x128xf32>
    %c0_6 = arith.constant 0 : index
    %c0_7 = arith.constant 0 : index
    %3 = vector.load %arg4[%c0_6, %c0_7] : memref<1x128xi32, #tpu.memory_space<vmem>>, vector<1x128xi32>
    %c1_i32 = arith.constant 1 : i32
    %4 = vector.broadcast %c1_i32 : i32 to vector<1x128xi32>
    %5 = arith.maxsi %3, %4 : vector<1x128xi32>
    %6 = tpu.iota {dimensions = array<i32: 0>} : vector<4x128xi32>
    %7 = vector.broadcast %5 : vector<1x128xi32> to vector<4x128xi32>
    %8 = arith.cmpi slt, %6, %7 : vector<4x128xi32>
    %c0_8 = arith.constant 0 : index
    %c0_9 = arith.constant 0 : index
    %9 = vector.load %arg5[%c0_8, %c0_9] : memref<16x32xf32, #tpu.memory_space<vmem>>, vector<16x32xf32>
    %c0_10 = arith.constant 0 : index
    %c0_11 = arith.constant 0 : index
    %10 = vector.load %arg8[%c0_10, %c0_11] : memref<16x1xf32, #tpu.memory_space<vmem>>, vector<16x1xf32>
    %c0_12 = arith.constant 0 : index
    %c0_13 = arith.constant 0 : index
    %11 = vector.load %arg6[%c0_12, %c0_13] : memref<16x32xf32, #tpu.memory_space<vmem>>, vector<16x32xf32>
    %cst = arith.constant dense<0.000000e+00> : vector<16x128xf32>
    %12 = tpu.matmul %11, %1, %cst {dimension_numbers = #tpu.dot_dimension_numbers<[1], [0], [0], [1], [0, 0, 1, 1], [], []>} : vector<16x32xf32>, vector<32x128xf32>, vector<16x128xf32> -> vector<16x128xf32>
    %c0_14 = arith.constant 0 : index
    %c0_15 = arith.constant 0 : index
    %13 = vector.load %arg7[%c0_14, %c0_15] : memref<16x1xf32, #tpu.memory_space<vmem>>, vector<16x1xf32>
    %14 = vector.broadcast %13 : vector<16x1xf32> to vector<16x128xf32>
    %15 = arith.addf %12, %14 : vector<16x128xf32>
    %16 = vector.extract_strided_slice %0 {offsets = [0, 0, 0], sizes = [1, 32, 128], strides = [1, 1, 1]} : vector<4x32x128xf32> to vector<1x32x128xf32>
    %17 = vector.shape_cast %16 : vector<1x32x128xf32> to vector<32x128xf32>
    %cst_16 = arith.constant dense<0.000000e+00> : vector<16x128xf32>
    %18 = tpu.matmul %9, %17, %cst_16 {dimension_numbers = #tpu.dot_dimension_numbers<[1], [0], [0], [1], [0, 0, 1, 1], [], []>} : vector<16x32xf32>, vector<32x128xf32>, vector<16x128xf32> -> vector<16x128xf32>
    %19 = arith.addf %18, %15 : vector<16x128xf32>
    %cst_17 = arith.constant 0.000000e+00 : f32
    %20 = vector.broadcast %cst_17 : f32 to vector<16x128xf32>
    %21 = arith.maximumf %19, %20 : vector<16x128xf32>
    %22 = vector.broadcast %10 : vector<16x1xf32> to vector<16x128xf32>
    %23 = arith.mulf %21, %22 : vector<16x128xf32>
    %cst_18 = arith.constant dense<0.000000e+00> : vector<128xf32>
    %24 = vector.multi_reduction <add>, %23, %cst_18 [0] : vector<16x128xf32> to vector<128xf32>
    %25 = vector.shape_cast %24 : vector<128xf32> to vector<1x128xf32>
    %26 = vector.extract_strided_slice %0 {offsets = [1, 0, 0], sizes = [1, 32, 128], strides = [1, 1, 1]} : vector<4x32x128xf32> to vector<1x32x128xf32>
    %27 = vector.shape_cast %26 : vector<1x32x128xf32> to vector<32x128xf32>
    %cst_19 = arith.constant dense<0.000000e+00> : vector<16x128xf32>
    %28 = tpu.matmul %9, %27, %cst_19 {dimension_numbers = #tpu.dot_dimension_numbers<[1], [0], [0], [1], [0, 0, 1, 1], [], []>} : vector<16x32xf32>, vector<32x128xf32>, vector<16x128xf32> -> vector<16x128xf32>
    %29 = arith.addf %28, %15 : vector<16x128xf32>
    %cst_20 = arith.constant 0.000000e+00 : f32
    %30 = vector.broadcast %cst_20 : f32 to vector<16x128xf32>
    %31 = arith.maximumf %29, %30 : vector<16x128xf32>
    %32 = vector.broadcast %10 : vector<16x1xf32> to vector<16x128xf32>
    %33 = arith.mulf %31, %32 : vector<16x128xf32>
    %cst_21 = arith.constant dense<0.000000e+00> : vector<128xf32>
    %34 = vector.multi_reduction <add>, %33, %cst_21 [0] : vector<16x128xf32> to vector<128xf32>
    %35 = vector.shape_cast %34 : vector<128xf32> to vector<1x128xf32>
    %36 = vector.extract_strided_slice %0 {offsets = [2, 0, 0], sizes = [1, 32, 128], strides = [1, 1, 1]} : vector<4x32x128xf32> to vector<1x32x128xf32>
    %37 = vector.shape_cast %36 : vector<1x32x128xf32> to vector<32x128xf32>
    %cst_22 = arith.constant dense<0.000000e+00> : vector<16x128xf32>
    %38 = tpu.matmul %9, %37, %cst_22 {dimension_numbers = #tpu.dot_dimension_numbers<[1], [0], [0], [1], [0, 0, 1, 1], [], []>} : vector<16x32xf32>, vector<32x128xf32>, vector<16x128xf32> -> vector<16x128xf32>
    %39 = arith.addf %38, %15 : vector<16x128xf32>
    %cst_23 = arith.constant 0.000000e+00 : f32
    %40 = vector.broadcast %cst_23 : f32 to vector<16x128xf32>
    %41 = arith.maximumf %39, %40 : vector<16x128xf32>
    %42 = vector.broadcast %10 : vector<16x1xf32> to vector<16x128xf32>
    %43 = arith.mulf %41, %42 : vector<16x128xf32>
    %cst_24 = arith.constant dense<0.000000e+00> : vector<128xf32>
    %44 = vector.multi_reduction <add>, %43, %cst_24 [0] : vector<16x128xf32> to vector<128xf32>
    %45 = vector.shape_cast %44 : vector<128xf32> to vector<1x128xf32>
    %46 = vector.extract_strided_slice %0 {offsets = [3, 0, 0], sizes = [1, 32, 128], strides = [1, 1, 1]} : vector<4x32x128xf32> to vector<1x32x128xf32>
    %47 = vector.shape_cast %46 : vector<1x32x128xf32> to vector<32x128xf32>
    %cst_25 = arith.constant dense<0.000000e+00> : vector<16x128xf32>
    %48 = tpu.matmul %9, %47, %cst_25 {dimension_numbers = #tpu.dot_dimension_numbers<[1], [0], [0], [1], [0, 0, 1, 1], [], []>} : vector<16x32xf32>, vector<32x128xf32>, vector<16x128xf32> -> vector<16x128xf32>
    %49 = arith.addf %48, %15 : vector<16x128xf32>
    %cst_26 = arith.constant 0.000000e+00 : f32
    %50 = vector.broadcast %cst_26 : f32 to vector<16x128xf32>
    %51 = arith.maximumf %49, %50 : vector<16x128xf32>
    %52 = vector.broadcast %10 : vector<16x1xf32> to vector<16x128xf32>
    %53 = arith.mulf %51, %52 : vector<16x128xf32>
    %cst_27 = arith.constant dense<0.000000e+00> : vector<128xf32>
    %54 = vector.multi_reduction <add>, %53, %cst_27 [0] : vector<16x128xf32> to vector<128xf32>
    %55 = vector.shape_cast %54 : vector<128xf32> to vector<1x128xf32>
    %56 = tpu.concatenate %25, %35, %45, %55 in 0 : vector<1x128xf32>, vector<1x128xf32>, vector<1x128xf32>, vector<1x128xf32> -> vector<4x128xf32>
    %cst_28 = arith.constant 0xFF800000 : f32
    %57 = vector.broadcast %cst_28 : f32 to vector<4x128xf32>
    %58 = arith.select %8, %56, %57 : vector<4x128xi1>, vector<4x128xf32>
    %cst_29 = arith.constant dense<0xFF800000> : vector<128xf32>
    %59 = vector.multi_reduction <maximumf>, %58, %cst_29 [0] : vector<4x128xf32> to vector<128xf32>
    %60 = vector.shape_cast %59 : vector<128xf32> to vector<1x128xf32>
    %61 = vector.broadcast %60 : vector<1x128xf32> to vector<4x128xf32>
    %62 = arith.subf %58, %61 : vector<4x128xf32>
    %63 = math.exp %62 : vector<4x128xf32>
    %cst_30 = arith.constant 0.000000e+00 : f32
    %64 = vector.broadcast %cst_30 : f32 to vector<4x128xf32>
    %65 = arith.select %8, %63, %64 : vector<4x128xi1>, vector<4x128xf32>
    %cst_31 = arith.constant dense<0.000000e+00> : vector<128xf32>
    %66 = vector.multi_reduction <add>, %65, %cst_31 [0] : vector<4x128xf32> to vector<128xf32>
    %67 = vector.shape_cast %66 : vector<128xf32> to vector<1x128xf32>
    %68 = vector.broadcast %67 : vector<1x128xf32> to vector<4x128xf32>
    %69 = arith.divf %65, %68 : vector<4x128xf32>
    %70 = vector.shape_cast %69 : vector<4x128xf32> to vector<4x1x128xf32>
    %71 = vector.shape_cast %1 : vector<32x128xf32> to vector<1x32x128xf32>
    %72 = vector.broadcast %70 : vector<4x1x128xf32> to vector<4x32x128xf32>
    %73 = vector.broadcast %71 : vector<1x32x128xf32> to vector<4x32x128xf32>
    %74 = arith.mulf %72, %73 : vector<4x32x128xf32>
    %75 = arith.addf %0, %74 : vector<4x32x128xf32>
    %c0_32 = arith.constant 0 : index
    %c0_33 = arith.constant 0 : index
    %76 = vector.load %arg9[%c0_32, %c0_33] : memref<32x32xf32, #tpu.memory_space<vmem>>, vector<32x32xf32>
    %c0_34 = arith.constant 0 : index
    %c0_35 = arith.constant 0 : index
    %77 = vector.load %arg10[%c0_34, %c0_35] : memref<32x1xf32, #tpu.memory_space<vmem>>, vector<32x1xf32>
    %cst_36 = arith.constant dense<0.000000e+00> : vector<32x128xf32>
    %78 = tpu.matmul %76, %2, %cst_36 {dimension_numbers = #tpu.dot_dimension_numbers<[1], [0], [0], [1], [0, 0, 1, 1], [], []>} : vector<32x32xf32>, vector<32x128xf32>, vector<32x128xf32> -> vector<32x128xf32>
    %79 = vector.broadcast %77 : vector<32x1xf32> to vector<32x128xf32>
    %80 = arith.addf %78, %79 : vector<32x128xf32>
    %cst_37 = arith.constant 0.000000e+00 : f32
    %81 = vector.broadcast %cst_37 : f32 to vector<32x128xf32>
    %82 = arith.maximumf %80, %81 : vector<32x128xf32>
    %83 = vector.extract_strided_slice %75 {offsets = [0, 0, 0], sizes = [1, 32, 128], strides = [1, 1, 1]} : vector<4x32x128xf32> to vector<1x32x128xf32>
    %84 = vector.shape_cast %83 : vector<1x32x128xf32> to vector<32x128xf32>
    %cst_38 = arith.constant dense<0.000000e+00> : vector<32x128xf32>
    %85 = tpu.matmul %76, %84, %cst_38 {dimension_numbers = #tpu.dot_dimension_numbers<[1], [0], [0], [1], [0, 0, 1, 1], [], []>} : vector<32x32xf32>, vector<32x128xf32>, vector<32x128xf32> -> vector<32x128xf32>
    %86 = vector.broadcast %77 : vector<32x1xf32> to vector<32x128xf32>
    %87 = arith.addf %85, %86 : vector<32x128xf32>
    %cst_39 = arith.constant 0.000000e+00 : f32
    %88 = vector.broadcast %cst_39 : f32 to vector<32x128xf32>
    %89 = arith.maximumf %87, %88 : vector<32x128xf32>
    %90 = arith.mulf %89, %82 : vector<32x128xf32>
    %cst_40 = arith.constant dense<0.000000e+00> : vector<128xf32>
    %91 = vector.multi_reduction <add>, %90, %cst_40 [0] : vector<32x128xf32> to vector<128xf32>
    %92 = vector.shape_cast %91 : vector<128xf32> to vector<1x128xf32>
    %cst_41 = arith.constant 0.176776692 : f32
    %93 = vector.broadcast %cst_41 : f32 to vector<1x128xf32>
    %94 = arith.mulf %92, %93 : vector<1x128xf32>
    %95 = vector.extract_strided_slice %75 {offsets = [1, 0, 0], sizes = [1, 32, 128], strides = [1, 1, 1]} : vector<4x32x128xf32> to vector<1x32x128xf32>
    %96 = vector.shape_cast %95 : vector<1x32x128xf32> to vector<32x128xf32>
    %cst_42 = arith.constant dense<0.000000e+00> : vector<32x128xf32>
    %97 = tpu.matmul %76, %96, %cst_42 {dimension_numbers = #tpu.dot_dimension_numbers<[1], [0], [0], [1], [0, 0, 1, 1], [], []>} : vector<32x32xf32>, vector<32x128xf32>, vector<32x128xf32> -> vector<32x128xf32>
    %98 = vector.broadcast %77 : vector<32x1xf32> to vector<32x128xf32>
    %99 = arith.addf %97, %98 : vector<32x128xf32>
    %cst_43 = arith.constant 0.000000e+00 : f32
    %100 = vector.broadcast %cst_43 : f32 to vector<32x128xf32>
    %101 = arith.maximumf %99, %100 : vector<32x128xf32>
    %102 = arith.mulf %101, %82 : vector<32x128xf32>
    %cst_44 = arith.constant dense<0.000000e+00> : vector<128xf32>
    %103 = vector.multi_reduction <add>, %102, %cst_44 [0] : vector<32x128xf32> to vector<128xf32>
    %104 = vector.shape_cast %103 : vector<128xf32> to vector<1x128xf32>
    %cst_45 = arith.constant 0.176776692 : f32
    %105 = vector.broadcast %cst_45 : f32 to vector<1x128xf32>
    %106 = arith.mulf %104, %105 : vector<1x128xf32>
    %107 = vector.extract_strided_slice %75 {offsets = [2, 0, 0], sizes = [1, 32, 128], strides = [1, 1, 1]} : vector<4x32x128xf32> to vector<1x32x128xf32>
    %108 = vector.shape_cast %107 : vector<1x32x128xf32> to vector<32x128xf32>
    %cst_46 = arith.constant dense<0.000000e+00> : vector<32x128xf32>
    %109 = tpu.matmul %76, %108, %cst_46 {dimension_numbers = #tpu.dot_dimension_numbers<[1], [0], [0], [1], [0, 0, 1, 1], [], []>} : vector<32x32xf32>, vector<32x128xf32>, vector<32x128xf32> -> vector<32x128xf32>
    %110 = vector.broadcast %77 : vector<32x1xf32> to vector<32x128xf32>
    %111 = arith.addf %109, %110 : vector<32x128xf32>
    %cst_47 = arith.constant 0.000000e+00 : f32
    %112 = vector.broadcast %cst_47 : f32 to vector<32x128xf32>
    %113 = arith.maximumf %111, %112 : vector<32x128xf32>
    %114 = arith.mulf %113, %82 : vector<32x128xf32>
    %cst_48 = arith.constant dense<0.000000e+00> : vector<128xf32>
    %115 = vector.multi_reduction <add>, %114, %cst_48 [0] : vector<32x128xf32> to vector<128xf32>
    %116 = vector.shape_cast %115 : vector<128xf32> to vector<1x128xf32>
    %cst_49 = arith.constant 0.176776692 : f32
    %117 = vector.broadcast %cst_49 : f32 to vector<1x128xf32>
    %118 = arith.mulf %116, %117 : vector<1x128xf32>
    %119 = vector.extract_strided_slice %75 {offsets = [3, 0, 0], sizes = [1, 32, 128], strides = [1, 1, 1]} : vector<4x32x128xf32> to vector<1x32x128xf32>
    %120 = vector.shape_cast %119 : vector<1x32x128xf32> to vector<32x128xf32>
    %cst_50 = arith.constant dense<0.000000e+00> : vector<32x128xf32>
    %121 = tpu.matmul %76, %120, %cst_50 {dimension_numbers = #tpu.dot_dimension_numbers<[1], [0], [0], [1], [0, 0, 1, 1], [], []>} : vector<32x32xf32>, vector<32x128xf32>, vector<32x128xf32> -> vector<32x128xf32>
    %122 = vector.broadcast %77 : vector<32x1xf32> to vector<32x128xf32>
    %123 = arith.addf %121, %122 : vector<32x128xf32>
    %cst_51 = arith.constant 0.000000e+00 : f32
    %124 = vector.broadcast %cst_51 : f32 to vector<32x128xf32>
    %125 = arith.maximumf %123, %124 : vector<32x128xf32>
    %126 = arith.mulf %125, %82 : vector<32x128xf32>
    %cst_52 = arith.constant dense<0.000000e+00> : vector<128xf32>
    %127 = vector.multi_reduction <add>, %126, %cst_52 [0] : vector<32x128xf32> to vector<128xf32>
    %128 = vector.shape_cast %127 : vector<128xf32> to vector<1x128xf32>
    %cst_53 = arith.constant 0.176776692 : f32
    %129 = vector.broadcast %cst_53 : f32 to vector<1x128xf32>
    %130 = arith.mulf %128, %129 : vector<1x128xf32>
    %131 = tpu.concatenate %94, %106, %118, %130 in 0 : vector<1x128xf32>, vector<1x128xf32>, vector<1x128xf32>, vector<1x128xf32> -> vector<4x128xf32>
    %cst_54 = arith.constant 0xFF800000 : f32
    %132 = vector.broadcast %cst_54 : f32 to vector<4x128xf32>
    %133 = arith.select %8, %131, %132 : vector<4x128xi1>, vector<4x128xf32>
    %cst_55 = arith.constant dense<0xFF800000> : vector<128xf32>
    %134 = vector.multi_reduction <maximumf>, %133, %cst_55 [0] : vector<4x128xf32> to vector<128xf32>
    %135 = vector.shape_cast %134 : vector<128xf32> to vector<1x128xf32>
    %136 = vector.broadcast %135 : vector<1x128xf32> to vector<4x128xf32>
    %137 = arith.subf %133, %136 : vector<4x128xf32>
    %138 = math.exp %137 : vector<4x128xf32>
    %cst_56 = arith.constant 0.000000e+00 : f32
    %139 = vector.broadcast %cst_56 : f32 to vector<4x128xf32>
    %140 = arith.select %8, %138, %139 : vector<4x128xi1>, vector<4x128xf32>
    %cst_57 = arith.constant dense<0.000000e+00> : vector<128xf32>
    %141 = vector.multi_reduction <add>, %140, %cst_57 [0] : vector<4x128xf32> to vector<128xf32>
    %142 = vector.shape_cast %141 : vector<128xf32> to vector<1x128xf32>
    %143 = vector.broadcast %142 : vector<1x128xf32> to vector<4x128xf32>
    %144 = arith.divf %140, %143 : vector<4x128xf32>
    %145 = vector.shape_cast %144 : vector<4x128xf32> to vector<4x1x128xf32>
    %146 = vector.broadcast %145 : vector<4x1x128xf32> to vector<4x32x128xf32>
    %147 = arith.mulf %146, %75 : vector<4x32x128xf32>
    %cst_58 = arith.constant dense<0.000000e+00> : vector<32x128xf32>
    %148 = vector.multi_reduction <add>, %147, %cst_58 [0] : vector<4x32x128xf32> to vector<32x128xf32>
    %149 = arith.mulf %148, %2 : vector<32x128xf32>
    %150 = tpu.concatenate %149, %148, %2 in 0 : vector<32x128xf32>, vector<32x128xf32>, vector<32x128xf32> -> vector<96x128xf32>
    %c0_59 = arith.constant 0 : index
    %c0_60 = arith.constant 0 : index
    %151 = vector.load %arg11[%c0_59, %c0_60] : memref<8x96xf32, #tpu.memory_space<vmem>>, vector<8x96xf32>
    %cst_61 = arith.constant dense<0.000000e+00> : vector<8x128xf32>
    %152 = tpu.matmul %151, %150, %cst_61 {dimension_numbers = #tpu.dot_dimension_numbers<[1], [0], [0], [1], [0, 0, 1, 1], [], []>} : vector<8x96xf32>, vector<96x128xf32>, vector<8x128xf32> -> vector<8x128xf32>
    %c0_62 = arith.constant 0 : index
    %c0_63 = arith.constant 0 : index
    %153 = vector.load %arg12[%c0_62, %c0_63] : memref<8x1xf32, #tpu.memory_space<vmem>>, vector<8x1xf32>
    %154 = vector.broadcast %153 : vector<8x1xf32> to vector<8x128xf32>
    %155 = arith.addf %152, %154 : vector<8x128xf32>
    %cst_64 = arith.constant 0.000000e+00 : f32
    %156 = vector.broadcast %cst_64 : f32 to vector<8x128xf32>
    %157 = arith.maximumf %155, %156 : vector<8x128xf32>
    %c0_65 = arith.constant 0 : index
    %c0_66 = arith.constant 0 : index
    %158 = vector.load %arg13[%c0_65, %c0_66] : memref<8x1xf32, #tpu.memory_space<vmem>>, vector<8x1xf32>
    %159 = vector.broadcast %158 : vector<8x1xf32> to vector<8x128xf32>
    %160 = arith.mulf %157, %159 : vector<8x128xf32>
    %cst_67 = arith.constant dense<0.000000e+00> : vector<128xf32>
    %161 = vector.multi_reduction <add>, %160, %cst_67 [0] : vector<8x128xf32> to vector<128xf32>
    %162 = vector.shape_cast %161 : vector<128xf32> to vector<1x128xf32>
    %c0_68 = arith.constant 0 : index
    %c0_69 = arith.constant 0 : index
    %163 = memref.load %arg14[%c0_68, %c0_69] : memref<1x1xf32, #tpu.memory_space<smem>>
    %164 = vector.broadcast %163 : f32 to vector<1x128xf32>
    %165 = arith.addf %162, %164 : vector<1x128xf32>
    %cst_70 = arith.constant 0.000000e+00 : f32
    %166 = vector.broadcast %cst_70 : f32 to vector<1x128xf32>
    %167 = arith.subf %166, %165 : vector<1x128xf32>
    %168 = math.exp %167 : vector<1x128xf32>
    %cst_71 = arith.constant 1.000000e+00 : f32
    %169 = vector.broadcast %cst_71 : f32 to vector<1x128xf32>
    %170 = arith.addf %169, %168 : vector<1x128xf32>
    %cst_72 = arith.constant 1.000000e+00 : f32
    %171 = vector.broadcast %cst_72 : f32 to vector<1x128xf32>
    %172 = arith.divf %171, %170 : vector<1x128xf32>
    %c0_73 = arith.constant 0 : index
    %c0_74 = arith.constant 0 : index
    %173 = vector.load %arg15[%c0_73, %c0_74] : memref<1x128xf32, #tpu.memory_space<vmem>>, vector<1x128xf32>
    tpu.vector_store %arg15[%c0_73, %c0_74], %172 {strides = array<i32>} : memref<1x128xf32, #tpu.memory_space<vmem>>, vector<1x128xf32>,
    return
  }
  func.func @transform_0(%arg0: i32) -> (i32, i32, i32) {
    %c0_i32 = arith.constant 0 : i32
    %c0_i32_0 = arith.constant 0 : i32
    %c0_i32_1 = arith.constant 0 : i32
    return %c0_i32, %c0_i32_0, %arg0 : i32, i32, i32
  }
  func.func @transform_1(%arg0: i32) -> (i32, i32) {
    %c0_i32 = arith.constant 0 : i32
    %c0_i32_0 = arith.constant 0 : i32
    return %c0_i32, %arg0 : i32, i32
  }
  func.func @transform_2(%arg0: i32) -> (i32, i32) {
    %c0_i32 = arith.constant 0 : i32
    %c0_i32_0 = arith.constant 0 : i32
    return %c0_i32, %arg0 : i32, i32
  }
  func.func @transform_3(%arg0: i32) -> (i32, i32) {
    %c0_i32 = arith.constant 0 : i32
    %c0_i32_0 = arith.constant 0 : i32
    return %c0_i32, %arg0 : i32, i32
  }
  func.func @transform_4(%arg0: i32) -> (i32, i32) {
    %c0_i32 = arith.constant 0 : i32
    %c0_i32_0 = arith.constant 0 : i32
    %c0_i32_1 = arith.constant 0 : i32
    return %c0_i32, %c0_i32_0 : i32, i32
  }
  func.func @transform_5(%arg0: i32) -> (i32, i32) {
    %c0_i32 = arith.constant 0 : i32
    %c0_i32_0 = arith.constant 0 : i32
    %c0_i32_1 = arith.constant 0 : i32
    return %c0_i32, %c0_i32_0 : i32, i32
  }
  func.func @transform_6(%arg0: i32) -> (i32, i32) {
    %c0_i32 = arith.constant 0 : i32
    %c0_i32_0 = arith.constant 0 : i32
    %c0_i32_1 = arith.constant 0 : i32
    return %c0_i32, %c0_i32_0 : i32, i32
  }
  func.func @transform_7(%arg0: i32) -> (i32, i32) {
    %c0_i32 = arith.constant 0 : i32
    %c0_i32_0 = arith.constant 0 : i32
    %c0_i32_1 = arith.constant 0 : i32
    return %c0_i32, %c0_i32_0 : i32, i32
  }
  func.func @transform_8(%arg0: i32) -> (i32, i32) {
    %c0_i32 = arith.constant 0 : i32
    %c0_i32_0 = arith.constant 0 : i32
    %c0_i32_1 = arith.constant 0 : i32
    return %c0_i32, %c0_i32_0 : i32, i32
  }
  func.func @transform_9(%arg0: i32) -> (i32, i32) {
    %c0_i32 = arith.constant 0 : i32
    %c0_i32_0 = arith.constant 0 : i32
    %c0_i32_1 = arith.constant 0 : i32
    return %c0_i32, %c0_i32_0 : i32, i32
  }
  func.func @transform_10(%arg0: i32) -> (i32, i32) {
    %c0_i32 = arith.constant 0 : i32
    %c0_i32_0 = arith.constant 0 : i32
    %c0_i32_1 = arith.constant 0 : i32
    return %c0_i32, %c0_i32_0 : i32, i32
  }
  func.func @transform_11(%arg0: i32) -> (i32, i32) {
    %c0_i32 = arith.constant 0 : i32
    %c0_i32_0 = arith.constant 0 : i32
    %c0_i32_1 = arith.constant 0 : i32
    return %c0_i32, %c0_i32_0 : i32, i32
  }
  func.func @transform_12(%arg0: i32) -> (i32, i32) {
    %c0_i32 = arith.constant 0 : i32
    %c0_i32_0 = arith.constant 0 : i32
    %c0_i32_1 = arith.constant 0 : i32
    return %c0_i32, %c0_i32_0 : i32, i32
  }
  func.func @transform_13(%arg0: i32) -> (i32, i32) {
    %c0_i32 = arith.constant 0 : i32
    %c0_i32_0 = arith.constant 0 : i32
    %c0_i32_1 = arith.constant 0 : i32
    return %c0_i32, %c0_i32_0 : i32, i32
  }
  func.func @transform_14(%arg0: i32) -> (i32, i32) {
    %c0_i32 = arith.constant 0 : i32
    %c0_i32_0 = arith.constant 0 : i32
    return %c0_i32, %arg0 : i32, i32
  }
}

</mosaic_0001>

<bundles_post_ra>
// kernel: tpu_custom_call.1
= control target key start
LH: loop header
LB: loop body
LE: loop exit
PB: predicated region body
PF: predicated region fallthrough
CT: control target
= control target key end

     0   :  { %20 = vsyncpa [#allocation4], 0  ;;  %s2485_s0 = inlined_call_operand.hbm [shape: f32[4,32,128], index: 0, kind: input, shape index: {}]   ;;  %s2486_s1 = inlined_call_operand.vmem [shape: f32[32,128], index: 1, kind: input, shape index: {}]   ;;  %s2487_s2 = inlined_call_operand.vmem [shape: f32[32,128], index: 2, kind: input, shape index: {}]   ;;  %s2488_s3 = inlined_call_operand.vmem [shape: s32[1,128], index: 3, kind: input, shape index: {}]   ;;  %s2489_s4 = inlined_call_operand.hbm [shape: f32[16,32], index: 4, kind: input, shape index: {}]   ;;  %s2490_s5 = inlined_call_operand.hbm [shape: f32[16,32], index: 5, kind: input, shape index: {}]   ;;  %s2491_s6 = inlined_call_operand.vmem [shape: f32[16,1], index: 6, kind: input, shape index: {}]   ;;  %s2492_s7 = inlined_call_operand.vmem [shape: f32[16,1], index: 7, kind: input, shape index: {}]   ;;  %s2493_s8 = inlined_call_operand.vmem [shape: f32[32,32], index: 8, kind: input, shape index: {}]   ;;  %s2494_s9 = inlined_call_operand.vmem [shape: f32[32,1], index: 9, kind: input, shape index: {}]   ;;  %s2495_s10 = inlined_call_operand.vmem [shape: f32[8,96], index: 10, kind: input, shape index: {}]   ;;  %s2496_s11 = inlined_call_operand.vmem [shape: f32[8,1], index: 11, kind: input, shape index: {}]   ;;  %s2497_s12 = inlined_call_operand.vmem [shape: f32[8,1], index: 12, kind: input, shape index: {}]   ;;  %s2498_s13 = inlined_call_operand.<no memory space> [shape: f32[1,1], index: 13, kind: input, shape index: {}]   ;;  %s2499_s14 = inlined_call_operand.hbm [shape: f32[1,128], index: 14, kind: output, shape index: {}]  }
   0x1   :  { %21 = vsyncpa [#allocation7], 0 }
   0x2   :  { %22 = vsyncpa [#allocation5], 0  ;;  %s1935_s29 = smov [#allocation6]   ;;  %s1936_s15 = smov [#allocation3]  }
   0x3   :  { %s46_s30 = sshll.u32 %s1935_s29, 4  ;;  %s28_s16 = sshll.u32 %s1936_s15, 4  ;;  %s47_s30 = int_to_ptr.vmem [resolvable:$true] %s46_s30  ;;  %s2021_s16 = int_to_ptr.vmem [resolvable:$true] %s28_s16 }
   0x4   :  { %s1841_s19 = scalar_lea.hbm %s2489_s4, 256 }
   0x5   :  { %p1842_p0 = scmp.ne.s32.totalorder %s2489_s4, %s1841_s19  ;;  %p1845_p1 = scmp.lt.u32.totalorder %s1841_s19, %s2489_s4 }
   0x7   :  { %p1847_p2 = pnand %p1845_p1, %p1842_p0 }
   0x9   :  { %1850 = shalt.err (!%p1847_p2)
}
   0xa   :  { %s1851_s24 = scalar_lea.vmem %s47_s30, 256  ;;  %p1856_p4 = scmp.lt.s32.totalorder %s47_s30, %s47_s30 }
   0xb   :  { %p1852_p3 = scmp.ne.s32.totalorder %s47_s30, %s1851_s24  ;;  %p1857_p5 = scmp.lt.s32.totalorder %s1851_s24, %s1851_s24 }
   0xd   :  { %p1858_p6 = por %p1857_p5, %p1856_p4 }
   0xf   :  { %p1859_p7 = pnand %p1858_p6, %p1852_p3 }
  0x11   :  { %1862 = shalt.err (!%p1859_p7)
}
  0x12   :  { %s1937_s25 = smov 128   ;;  %s1938_s26 = smov 8  }
  0x13   :  { %52 = dma.hbm_to_vmem [thread:$0]  %s2489_s4, 256, %s47_s30, [#allocation7], %s1937_s25, %s1937_s25, %s1938_s26  }
  0x14   :  { %s1863_s17 = scalar_lea.hbm %s2485_s0, 2048 }
  0x15   :  { %p1864_p8 = scmp.ne.s32.totalorder %s2485_s0, %s1863_s17  ;;  %p1867_p9 = scmp.lt.u32.totalorder %s1863_s17, %s2485_s0 }
  0x17   :  { %p1869_p10 = pnand %p1867_p9, %p1864_p8 }
  0x19   :  { %1872 = shalt.err (!%p1869_p10)
}
  0x1a   :  { %s1873_s22 = scalar_lea.vmem %s2021_s16, 2048  ;;  %p1878_p12 = scmp.lt.s32.totalorder %s2021_s16, %s2021_s16 }
  0x1b   :  { %p1874_p11 = scmp.ne.s32.totalorder %s2021_s16, %s1873_s22  ;;  %p1879_p13 = scmp.lt.s32.totalorder %s1873_s22, %s1873_s22 }
  0x1d   :  { %p1880_p0 = por %p1879_p13, %p1878_p12 }
  0x1f   :  { %p1881_p1 = pnand %p1880_p0, %p1874_p11 }
  0x21   :  { %1884 = shalt.err (!%p1881_p1)
}
  0x22   :  { %34 = dma.hbm_to_vmem [thread:$0]  %s2485_s0, 2048, %s2021_s16, [#allocation4], %s1937_s25, %s1937_s25, %s1938_s26  }
  0x23   :  { %s1939_s23 = smov [#allocation8]   ;;  %s1885_s29 = scalar_lea.hbm %s2490_s5, 256 }
  0x24   :  { %s58_s24 = sshll.u32 %s1939_s23, 4  ;;  %p1886_p2 = scmp.ne.s32.totalorder %s2490_s5, %s1885_s29  ;;  %s59_s24 = int_to_ptr.vmem [resolvable:$true] %s58_s24 }
  0x25   :  { %p1889_p3 = scmp.lt.u32.totalorder %s1885_s29, %s2490_s5 }
  0x27   :  { %p1891_p4 = pnand %p1889_p3, %p1886_p2 }
  0x29   :  { %1894 = shalt.err (!%p1891_p4)
}
  0x2a   :  { %s1895_s20 = scalar_lea.vmem %s59_s24, 256  ;;  %p1900_p6 = scmp.lt.s32.totalorder %s59_s24, %s59_s24 }
  0x2b   :  { %p1896_p5 = scmp.ne.s32.totalorder %s59_s24, %s1895_s20  ;;  %p1901_p7 = scmp.lt.s32.totalorder %s1895_s20, %s1895_s20 }
  0x2d   :  { %p1902_p8 = por %p1901_p7, %p1900_p6 }
  0x2f   :  { %p1903_p9 = pnand %p1902_p8, %p1896_p5 }
  0x31   :  { %1906 = shalt.err (!%p1903_p9)
}
  0x32   :  { %64 = dma.hbm_to_vmem [thread:$0]  %s2490_s5, 256, %s59_s24, [#allocation7], %s1937_s25, %s1937_s25, %s1938_s26  }
  0x33   :  { %1929 = dma.done.wait [#allocation4], 2048  }
  0x34   :  { %1930 = vsyncadd [#allocation4], 4294965248 }
  0x35   :  { %1931 = dma.done.wait [#allocation7], 512  }
  0x36   :  { %1932 = vsyncadd [#allocation7], 4294966784  ;;  %v1940_v0 = vmov 0   ;;  %v2076_v1 = vld [vmem:[%s2486_s1] sm:$0xff]  ;;  %v2081_v2 = vld [vmem:[%s2486_s1 + $0x8] sm:$0xff]  ;;  %vm142_vm0 = vcmask 261120  }
  0x37   :  { %1827 = vset.pattern.permute.xlu0 %v1940_v0  ;;  %1828 = vset.pattern.permute.xlu1 %v1940_v0  ;;  %v2083_v3 = vld [vmem:[#allocation3 + $0x20] sm:$0xff]  ;;  %v1718_v4 = vpack.c.bf16 %v2081_v2, %v2076_v1  ;;  %v2087_v5 = vld [vmem:[#allocation3 + $0x28] sm:$0xff]  ;;  %v2092_v6 = vld [vmem:[%s2486_s1 + $0x10] sm:$0xff]  ;;  %vm584_vm1 = vcmask 1040384   ;;  %vm586_vm3 = vcmask 1041408   ;;  %vm588_vm4 = vcmask 1042432  }
  0x38   :  { %v2097_v7 = vld [vmem:[%s2486_s1 + $0x18] sm:$0xff]  ;;  %v1734_v8 = vpack.c.bf16 %v2087_v5, %v2083_v3  ;;  %v2103_v10 = vld [vmem:[#allocation3 + $0x30] sm:$0xff]  ;;  %v2110_v14 = vld [vmem:[#allocation3] sm:$0xff]  ;;  %vm591_vm6 = vcmask 1043456   ;;  %vm1943_vm7 = vmmov 0   ;;  %vm1338_vm8 = vcmask 785408  }
  0x39   :  { %v1722_v9 = vpack.c.bf16 %v2097_v7, %v2092_v6  ;;  %v2105_v11 = vld [vmem:[#allocation3 + $0x38] sm:$0xff]  ;;  %v128_v12 = vld [vmem:[#allocation8] sm:$0xff]  ;;  %1719 = vmatprep.subr.bf16.mxu1 %v1718_v4  ;;  %v2112_v15 = vld [vmem:[#allocation3 + $0x8] sm:$0xff] }
  0x3a   :  { %v1738_v13 = vpack.c.bf16 %v2105_v11, %v2103_v10  ;;  %1574 = vmatprep.mubr.msk.f32.mxu1 %vm142_vm0, %v128_v12  ;;  %1735 = vmatprep.subr.bf16.mxu0 %v1734_v8  ;;  %v124_v16 = vld [vmem:[#allocation6] sm:$0xff]  ;;  %v2116_v18 = vld [vmem:[#allocation3 + $0x68] sm:$0xff]  ;;  %v1726_v19 = vpack.c.bf16 %v2112_v15, %v2110_v14  ;;  %v2123_v21 = vld [vmem:[#allocation3 + $0x10] sm:$0xff] }
  0x3b   :  { %1721 = vmatpush3.bf16.msra.mxu1 %v1718_v4  ;;  %v2114_v17 = vld [vmem:[#allocation3 + $0x60] sm:$0xff]  ;;  %1737 = vmatpush3.bf16.msra.mxu0 %v1734_v8  ;;  %v2125_v22 = vld [vmem:[#allocation3 + $0x18] sm:$0xff]  ;;  %v2127_v23 = vld [vmem:[#allocation3 + $0x70] sm:$0xff] }
  0x3c   :  { %1723 = vmatprep.subr.bf16.mxu1 %v1722_v9  ;;  %1739 = vmatprep.subr.bf16.mxu0 %v1738_v13  ;;  %v1750_v20 = vpack.c.bf16 %v2116_v18, %v2114_v17  ;;  %v2129_v24 = vld [vmem:[#allocation3 + $0x78] sm:$0xff]  ;;  %v125_v26 = vld [vmem:[#allocation6 + $0x8] sm:$0xff]  ;;  %v1730_v27 = vpack.c.bf16 %v2125_v22, %v2123_v21  ;;  %v2135_v29 = vld [vmem:[#allocation3 + $0x40] sm:$0xff] }
  0x3d   :  { %1596 = vmatprep.mubr.msk.f32.mxu0 %vm142_vm0, %v124_v16  ;;  %v129_v25 = vld [vmem:[#allocation8 + $0x8] sm:$0xff]  ;;  %v1754_v28 = vpack.c.bf16 %v2129_v24, %v2127_v23  ;;  %v2137_v30 = vld [vmem:[#allocation3 + $0x48] sm:$0xff]  ;;  %v130_v31 = vld [vmem:[%s2491_s6] sm:$0xff] }
  0x3e   :  { %134 = vperm.xlu0 %1827, %v130_v31   ;;  %v131_v32 = vld [vmem:[%s2491_s6 + $0x8] sm:$0xff]  ;;  %v1742_v33 = vpack.c.bf16 %v2137_v30, %v2135_v29  ;;  %v126_v34 = vld [vmem:[%s2492_s7] sm:$0xff]  ;;  %v2153_v35 = vld [vmem:[#allocation3 + $0x50] sm:$0xff] }
  0x3f   :  { %1725 = vmatpush3.bf16.msra.mxu1 %v1722_v9  ;;  %1741 = vmatpush3.bf16.msra.mxu0 %v1738_v13  ;;  %v2155_v36 = vld [vmem:[#allocation3 + $0x58] sm:$0xff]  ;;  %v693_v37 = vld [vmem:[%s2494_s9] sm:$0xff]  ;;  %v2171_v40 = vld [vmem:[%s2487_s2 + $0x8] sm:$0xff] }
  0x40   :  { %1727 = vmatprep.subr.bf16.mxu1 %v1726_v19  ;;  %1751 = vmatprep.subr.bf16.mxu0 %v1750_v20  ;;  %v1746_v38 = vpack.c.bf16 %v2155_v36, %v2153_v35  ;;  %v2166_v39 = vld [vmem:[%s2487_s2] sm:$0xff]  ;;  %v127_v41 = vld [vmem:[%s2492_s7 + $0x8] sm:$0xff]  ;;  %v695_v42 = vld [vmem:[%s2494_s9 + $0x10] sm:$0xff] }
  0x41   :  { %309 = vperm.xlu1 %1828, %v126_v34   ;;  %v2184_v43 = vpack.c.bf16 %v2171_v40, %v2166_v39  ;;  %v2189_v44 = vld [vmem:[%s2493_s8] sm:$0xff]  ;;  %v2194_v45 = vld [vmem:[%s2487_s2 + $0x10] sm:$0xff]  ;;  %v2199_v46 = vld [vmem:[%s2487_s2 + $0x18] sm:$0xff] }
  0x42   :  { %1575 = vmatmul.mubr.msk.f32.vlgmr.msra.gmra.mrb[0].mxu1 %vm142_vm0, %v129_v25  ;;  %1597 = vmatmul.mubr.msk.f32.vlgmr.msra.gmra.mrb[0].mxu0 %vm142_vm0, %v125_v26  ;;  %v694_v47 = vld [vmem:[%s2494_s9 + $0x8] sm:$0xff]  ;;  %v1332_v48 = vld [vmem:[%s2496_s11] sm:$0xff]  ;;  %v2212_v49 = vpack.c.bf16 %v2199_v46, %v2194_v45  ;;  %v696_v50 = vld [vmem:[%s2494_s9 + $0x18] sm:$0xff] }
  0x43   :  { %1729 = vmatpush3.bf16.msra.mxu1 %v1726_v19  ;;  %1753 = vmatpush3.bf16.msra.mxu0 %v1750_v20  ;;  %v1413_v51 = vld [vmem:[%s2497_s12] sm:$0xff]  ;;  %v2229_v52 = vld [vmem:[%s2493_s8 + $0x8] sm:$0xff]  ;;  %v2234_v53 = vld [vmem:[%s2493_s8 + $0x10] sm:$0xff] }
  0x44   :  { %1731 = vmatprep.subr.bf16.mxu1 %v1730_v27  ;;  %1755 = vmatprep.subr.bf16.mxu0 %v1754_v28  ;;  %v2243_v54 = vld [vmem:[%s2493_s8 + $0x18] sm:$0xff] }
  0x45   :  { %1585 = vmatprep.mubr.msk.f32.mxu1 %vm142_vm0, %v124_v16  ;;  %1618 = vmatprep.mubr.msk.f32.mxu0 %vm142_vm0, %v124_v16 }
  0x46   :  { %139 = vperm.xlu0 %1827, %v131_v32   ;;  %314 = vperm.xlu1 %1828, %v127_v41  }
  0x47   :  { %1733 = vmatpush3.bf16.msra.mxu1 %v1730_v27  ;;  %1757 = vmatpush3.bf16.msra.mxu0 %v1754_v28 }
  0x48   :  { %1743 = vmatprep.subr.bf16.mxu1 %v1742_v33 }
  0x4a   :  { %1586 = vmatmul.mubr.msk.f32.vlgmr.msra.gmra.mrb[2].mxu1 %vm142_vm0, %v125_v26  ;;  %699 = vperm.xlu0 %1827, %v693_v37  }
  0x4b   :  { %1619 = vmatmul.mubr.msk.f32.vlgmr.msra.gmra.mrb[2].mxu0 %vm142_vm0, %v125_v26  ;;  %1745 = vmatpush3.bf16.msra.mxu1 %v1742_v33 }
  0x4c   :  { %1747 = vmatprep.subr.bf16.mxu1 %v1746_v38  ;;  %1607 = vmatprep.mubr.msk.f32.mxu1 %vm142_vm0, %v124_v16 }
  0x4d   :  { %1643 = vmatprep.mubr.msk.f32.mxu0 %vm142_vm0, %v2189_v44  ;;  %704 = vperm.xlu1 %1828, %v694_v47  }
  0x4e   :  { %709 = vperm.xlu0 %1827, %v695_v42  }
  0x4f   :  { %1749 = vmatpush3.bf16.msra.mxu1 %v1746_v38 }
  0x50   :  { %1759 = vmatprep.subr.bf16.mxu1 %v2184_v43 }
  0x51   :  { %714 = vperm.xlu1 %1828, %v696_v50  }
  0x52   :  { %1608 = vmatmul.mubr.msk.f32.vlgmr.msra.gmra.mrb[4].mxu1 %vm142_vm0, %v125_v26  ;;  %1335 = vperm.xlu0 %1827, %v1332_v48  }
  0x53   :  { %1761 = vmatpush3.bf16.msra.mxu1 %v2184_v43  ;;  %1629 = vmatprep.mubr.msk.f32.mxu1 %vm142_vm0, %v2189_v44 }
  0x54   :  { %1763 = vmatprep.subr.bf16.mxu1 %v2212_v49 }
  0x55   :  { %1416 = vperm.xlu1 %1828, %v1413_v51  }
  0x57   :  { %1765 = vmatpush3.bf16.msra.mxu1 %v2212_v49 }
  0x5a   :  { %1630 = vmatmul.mubr.msk.f32.vlgmr.msra.gmra.mrb[6].mxu1 %vm142_vm0, %v2229_v52 }
  0x5b   :  { %1632 = vmatprep.mubr.msk.f32.mxu1 %vm142_vm0, %v2234_v53 }
  0x5e   :  { %1633 = vmatmul.mubr.msk.f32.gmra.mrb[8].mxu1 %vm142_vm0, %v2243_v54 }
  0x5f   :  { %1657 = vmatprep.mubr.msk.f32.mxu1 %vm142_vm0, %v2189_v44 }
  0xbd   :  { %v135_v55 = vpop.permute.xlu0 %134 }
  0xc0   :  { %v310_v57 = vpop.permute.xlu1 %309 }
  0xc5   :  { %v140_v56 = vpop.permute.xlu0 %139  ;;  %v315_v12 = vpop.permute.xlu1 %314 }
 0x115   :  { %v1576_v58 = vpop.f32.mrb[0].mxu1  ;;  %v1598_v61 = vpop.f32.mrb[0].mxu0 }
 0x116   :  { %v221_v59 = vadd.f32 %v1576_v58, %v140_v56  ;;  %v215_v60 = vpop.f32.mrb[1].mxu1  ;;  %v392_v63 = vpop.f32.mrb[1].mxu0 }
 0x117   :  { %v216_v62 = vadd.f32 %v215_v60, %v135_v55 }
 0x118   :  { %v398_v0 = vadd.f32 %v1598_v61, %v221_v59 }
 0x119   :  { %v393_v4 = vadd.f32 %v392_v63, %v216_v62 }
 0x11a   :  { %v402_v8 = vmax.f32 %v398_v0, 0.0 }
 0x11b   :  { %v401_v9 = vmax.f32 %v393_v4, 0.0 }
 0x11c   :  { %v404_v13 = vmul.f32 %v402_v8, %v315_v12 }
 0x11d   :  { %v403_v16 = vmul.f32 %v401_v9, %v310_v57  ;;  %v1587_v19 = vpop.f32.mrb[2].mxu1 }
 0x11e   :  { %v302_v20 = vadd.f32 %v1587_v19, %v221_v59  ;;  %v1620_v25 = vpop.f32.mrb[2].mxu0  ;;  %v296_v26 = vpop.f32.mrb[3].mxu1 }
 0x11f   :  { %v405_v27 = vadd.f32 %v404_v13, %v403_v16  ;;  %v570_v28 = vadd.f32 %v1620_v25, %v221_v59  ;;  %v297_v31 = vadd.f32 %v296_v26, %v216_v62  ;;  %v564_v32 = vpop.f32.mrb[3].mxu0 }
 0x120   :  { %v306_v33 = vmax.f32 %v302_v20, 0.0  ;;  %v565_v34 = vadd.f32 %v564_v32, %v216_v62 }
 0x121   :  { %v406_v37 = vrot.slane %v405_v27, 4  ;;  %v574_v38 = vmax.f32 %v570_v28, 0.0  ;;  %v305_v41 = vmax.f32 %v297_v31, 0.0  ;;  %v117_v28 = vlaneseq }
 0x122   :  { %v318_v42 = vmul.f32 %v315_v12, %v306_v33  ;;  %v573_v47 = vmax.f32 %v565_v34, 0.0  ;;  %v114_v34 = vld [vmem:[%s2488_s3] sm:$0x1] }
 0x123   :  { %v407_v48 = vadd.f32 %v406_v37, %v405_v27  ;;  %v576_v50 = vmul.f32 %v574_v38, %v315_v12  ;;  %v317_v51 = vmul.f32 %v310_v57, %v305_v41  ;;  %v118_v38 = vshrl.u32 %v117_v28, 7 }
 0x124   :  { %v575_v55 = vmul.f32 %v573_v47, %v310_v57  ;;  %vm115_vm2 = vcmp.gt.s32.totalorder %v114_v34, 1 }
 0x125   :  { %v408_v56 = vrot.slane %v407_v48, 2  ;;  %v319_v58 = vadd.f32 %v318_v42, %v317_v51  ;;  %v1609_v60 = vpop.f32.mrb[4].mxu1 }
 0x126   :  { %v577_v61 = vadd.f32 %v576_v50, %v575_v55  ;;  %v484_v63 = vadd.f32 %v1609_v60, %v221_v59  ;;  %v478_v0 = vpop.f32.mrb[5].mxu1  ;;  %v2258_v55 = vsub.s32 0, %v118_v38  ;;  %v116_v60 = vsel %vm115_vm2, %v114_v34, 1 }
 0x127   :  { %v320_v4 = vrot.slane %v319_v58, 4  ;;  %v479_v8 = vadd.f32 %v478_v0, %v216_v62  ;;  %v409_v16 = vadd.f32 %v408_v56, %v407_v48 }
 0x128   :  { %v578_v9 = vrot.slane %v577_v61, 4  ;;  %v488_v13 = vmax.f32 %v484_v63, 0.0 }
 0x129   :  { %v321_v19 = vadd.f32 %v320_v4, %v319_v58  ;;  %v487_v20 = vmax.f32 %v479_v8, 0.0  ;;  %v410_v32 = vrot.slane %v409_v16, 1  ;;  %v122_v4 = vrot.slane %v116_v60, %v2258_v55 }
 0x12a   :  { %v579_v25 = vadd.f32 %v578_v9, %v577_v61  ;;  %v490_v26 = vmul.f32 %v488_v13, %v315_v12 }
 0x12b   :  { %v322_v27 = vrot.slane %v321_v19, 2  ;;  %v489_v31 = vmul.f32 %v487_v20, %v310_v57  ;;  %v411_v12 = vadd.f32 %v410_v32, %v409_v16  ;;  %vm2264_vm5 = vcmp.lt.s32.totalorder %v118_v38, %v122_v4 }
 0x12c   :  { %v580_v62 = vrot.slane %v579_v25, 2 }
 0x12d   :  { %v323_v33 = vadd.f32 %v322_v27, %v321_v19  ;;  %v491_v59 = vadd.f32 %v490_v26, %v489_v31  ;;  %v2252_v37 = vpop.f32.mrb[6].mxu1 }
 0x12e   :  { %v2254_v41 = vpop.f32.mrb[7].mxu1  ;;  %v581_v51 = vadd.f32 %v580_v62, %v579_v25 }
 0x12f   :  { %v324_v42 = vrot.slane %v323_v33, 1  ;;  %v492_v47 = vrot.slane %v491_v59, 4 }
 0x130   :  { %v582_v0 = vrot.slane %v581_v51, 1 }
 0x131   :  { %v325_v48 = vadd.f32 %v324_v42, %v323_v33  ;;  %v493_v57 = vadd.f32 %v492_v47, %v491_v59  ;;  %v2256_v50 = vpop.f32.mrb[8].mxu1 }
 0x132   :  { %v2260_v56 = vpop.f32.mrb[9].mxu1  ;;  %v583_v13 = vadd.f32 %v582_v0, %v581_v51 }
 0x133   :  { %v585_v58 = vsel %vm584_vm1, %v325_v48, %v411_v12  ;;  %v494_v61 = vrot.slane %v493_v57, 2 }
 0x135   :  { %v495_v63 = vadd.f32 %v494_v61, %v493_v57 }
 0x137   :  { %v496_v8 = vrot.slane %v495_v63, 1 }
 0x139   :  { %v497_v9 = vadd.f32 %v496_v8, %v495_v63  ;;  %v1941_v63 = vmov 1966171168  }
 0x13a   :  { %v614_v0 = vunpack.c.l.s4 %v1941_v63 }
 0x13b   :  { %v587_v19 = vsel %vm586_vm3, %v585_v58, %v497_v9 }
 0x13c   :  { %v589_v20 = vsel %vm588_vm4, %v587_v19, %v583_v13  ;;  %v615_v4 = vunpack.c.0.s8 %v614_v0 }
 0x13d   :  { %v590_v25 = vsel %vm2264_vm5, %v589_v20, -inf }
 0x13e   :  { %v592_v26 = vsel %vm591_vm6, %v590_v25, -inf  ;;  %v2276_v8 = vsub.s32 %v615_v4, %v118_v38 }
 0x13f   :  { %v593_v28 = vrot.slane %v592_v26, 4 }
 0x141   :  { %v594_v27 = vmax.f32 %v592_v26, %v593_v28 }
 0x143   :  { %v595_v31 = vrot.slane %v594_v27, 2 }
 0x145   :  { %v596_v32 = vmax.f32 %v594_v27, %v595_v31 }
 0x147   :  { %v597_v33 = vrot.slane %v596_v32, 1 }
 0x149   :  { %v598_v34 = vmax.f32 %v596_v32, %v597_v33 }
 0x14b   :  { %v599_v59 = vsub.f32 %v590_v25, %v598_v34 }
 0x14d   :  { %v600_v62 = vmul.f32 1.442695, %v599_v59 }
 0x14f   :  { %1829 = vpow2.f32 %v600_v62 }
 0x159   :  { %v1830_v42 = vpop.eup %1829 }
 0x15a   :  { %v602_v47 = vsel %vm2264_vm5, %v1830_v42, 0.0 }
 0x15b   :  { %v603_v12 = vsel %vm591_vm6, %v602_v47, 0.0 }
 0x15c   :  { %v604_v48 = vrot.slane %v603_v12, 4 }
 0x15e   :  { %v605_v57 = vadd.f32 %v604_v48, %v603_v12 }
 0x160   :  { %v606_v51 = vrot.slane %v605_v57, 2 }
 0x162   :  { %v607_v58 = vadd.f32 %v606_v51, %v605_v57 }
 0x164   :  { %v608_v60 = vrot.slane %v607_v58, 1 }
 0x166   :  { %v609_v61 = vadd.f32 %v608_v60, %v607_v58 }
 0x168   :  { %1831 = vrcp.f32 %v609_v61 }
 0x172   :  { %v1832_v9 = vpop.eup %1831 }
 0x173   :  { %v611_v13 = vmul.f32 %v1832_v9, %v602_v47 }
 0x175   :  { %v619_v19 = vrot.slane %v611_v13, %v2276_v8 }
 0x177   :  { %v627_v20 = vrot.slane %v619_v19, %v2276_v8  ;;  %v620_v25 = vcombine.high %v619_v19, %v619_v19 }
 0x179   :  { %v640_v26 = vrot.slane %v627_v20, %v2258_v55  ;;  %v634_v28 = vrot.slane %v620_v25, %v2276_v8  ;;  %v635_v27 = vcombine.high %v627_v20, %v627_v20 }
 0x17b   :  { %v657_v31 = vmul.f32 %v640_v26, %v2076_v1  ;;  %v658_v32 = vmul.f32 %v640_v26, %v2081_v2  ;;  %v659_v33 = vmul.f32 %v640_v26, %v2092_v6  ;;  %v660_v38 = vmul.f32 %v640_v26, %v2097_v7 }
 0x17c   :  { %v644_v34 = vrot.slane %v634_v28, %v2258_v55  ;;  %v648_v59 = vrot.slane %v635_v27, %v2258_v55  ;;  %v636_v62 = vcombine.high %v634_v28, %v634_v28 }
 0x17d   :  { %v2289_v42 = vadd.f32 %v657_v31, %v2110_v14  ;;  %v2292_v47 = vadd.f32 %v658_v32, %v2112_v15  ;;  %v2295_v12 = vadd.f32 %v659_v33, %v2123_v21  ;;  %v2298_v48 = vadd.f32 %v660_v38, %v2125_v22 }
 0x17e   :  { %v661_v57 = vmul.f32 %v644_v34, %v2076_v1  ;;  %v662_v51 = vmul.f32 %v644_v34, %v2081_v2  ;;  %v663_v58 = vmul.f32 %v644_v34, %v2092_v6  ;;  %v664_v60 = vmul.f32 %v644_v34, %v2097_v7 }
 0x17f   :  { %v1766_v14 = vpack.c.bf16 %v2292_v47, %v2289_v42  ;;  %v1770_v15 = vpack.c.bf16 %v2298_v48, %v2295_v12  ;;  %v665_v21 = vmul.f32 %v648_v59, %v2076_v1  ;;  %v666_v61 = vmul.f32 %v648_v59, %v2081_v2 }
 0x180   :  { %v2311_v22 = vadd.f32 %v661_v57, %v2083_v3  ;;  %v2314_v63 = vadd.f32 %v662_v51, %v2087_v5  ;;  %v2317_v0 = vadd.f32 %v663_v58, %v2103_v10  ;;  %v2320_v4 = vadd.f32 %v664_v60, %v2105_v11 }
 0x181   :  { %1767 = vmatprep.subr.bf16.mxu0 %v1766_v14  ;;  %v2323_v9 = vadd.f32 %v665_v21, %v2135_v29  ;;  %v2326_v13 = vadd.f32 %v666_v61, %v2137_v30  ;;  %v652_v19 = vrot.slane %v636_v62, %v2258_v55  ;;  %v667_v3 = vmul.f32 %v648_v59, %v2092_v6 }
 0x182   :  { %1769 = vmatpush3.bf16.msra.mxu0 %v1766_v14  ;;  %v1774_v5 = vpack.c.bf16 %v2314_v63, %v2311_v22  ;;  %v668_v10 = vmul.f32 %v648_v59, %v2097_v7  ;;  %v1778_v29 = vpack.c.bf16 %v2320_v4, %v2317_v0 }
 0x183   :  { %1771 = vmatprep.subr.bf16.mxu0 %v1770_v15  ;;  %v669_v11 = vmul.f32 %v652_v19, %v2076_v1  ;;  %v670_v20 = vmul.f32 %v652_v19, %v2081_v2  ;;  %v1782_v30 = vpack.c.bf16 %v2326_v13, %v2323_v9  ;;  %v671_v25 = vmul.f32 %v652_v19, %v2092_v6 }
 0x184   :  { %1775 = vmatprep.subr.bf16.mxu1 %v1774_v5  ;;  %v672_v26 = vmul.f32 %v652_v19, %v2097_v7  ;;  %v2348_v1 = vadd.f32 %v667_v3, %v2153_v35  ;;  %v2351_v2 = vadd.f32 %v668_v10, %v2155_v36  ;;  %v700_v35 = vpop.permute.xlu0 %699  ;;  %v705_v36 = vpop.permute.xlu1 %704 }
 0x185   :  { %1777 = vmatpush3.bf16.msra.mxu1 %v1774_v5  ;;  %v2342_v28 = vadd.f32 %v669_v11, %v2114_v17  ;;  %v2345_v27 = vadd.f32 %v670_v20, %v2116_v18  ;;  %v2356_v7 = vadd.f32 %v671_v25, %v2127_v23  ;;  %v796_v31 = vadd.f32 %v2254_v41, %v700_v35 }
 0x186   :  { %1779 = vmatprep.subr.bf16.mxu1 %v1778_v29  ;;  %1773 = vmatpush3.bf16.msra.mxu0 %v1770_v15  ;;  %v2359_v17 = vadd.f32 %v672_v26, %v2129_v24  ;;  %v1786_v18 = vpack.c.bf16 %v2351_v2, %v2348_v1  ;;  %v1942_v24 = vmov 0.0|0.0  }
 0x187   :  { %1783 = vmatprep.subr.bf16.mxu0 %v1782_v30  ;;  %v1790_v6 = vpack.c.bf16 %v2345_v27, %v2342_v28 }
 0x188   :  { %v1794_v23 = vpack.c.bf16 %v2359_v17, %v2356_v7  ;;  %v2396_v38 = vpop.permute.xlu0 %709 }
 0x189   :  { %1781 = vmatpush3.bf16.msra.mxu1 %v1778_v29  ;;  %1644 = vmatmul.mubr.msk.f32.vlgmr.msra.gmra.mrb[4].mxu0 %vm142_vm0, %v2229_v52  ;;  %v806_v62 = vadd.f32 %v2260_v56, %v2396_v38 }
 0x18a   :  { %1791 = vmatprep.subr.bf16.mxu1 %v1790_v6  ;;  %1785 = vmatpush3.bf16.msra.mxu0 %v1782_v30 }
 0x18b   :  { %1787 = vmatprep.subr.bf16.mxu0 %v1786_v18  ;;  %1646 = vmatprep.mubr.msk.f32.mxu0 %vm142_vm0, %v2234_v53  ;;  %v2409_v56 = vmax.f32 %v806_v62, 0.0 }
 0x18c   :  { %1658 = vmatmul.mubr.msk.f32.vlgmr.msra.gmra.mrb[10].mxu1 %vm142_vm0, %v2229_v52 }
 0x18d   :  { %1793 = vmatpush3.bf16.msra.mxu1 %v1790_v6  ;;  %1647 = vmatmul.mubr.msk.f32.gmra.mrb[6].mxu0 %vm142_vm0, %v2243_v54 }
 0x18e   :  { %1795 = vmatprep.subr.bf16.mxu1 %v1794_v23  ;;  %1660 = vmatprep.mubr.msk.f32.mxu1 %vm142_vm0, %v2234_v53 }
 0x18f   :  { %1789 = vmatpush3.bf16.msra.mxu0 %v1786_v18  ;;  %1671 = vmatprep.mubr.msk.f32.mxu0 %vm142_vm0, %v2189_v44 }
 0x190   :  { %1661 = vmatmul.mubr.msk.f32.gmra.mrb[12].mxu1 %vm142_vm0, %v2243_v54  ;;  %1798 = vmatprep.subr.bf16.mxu0 %v1942_v24 }
 0x191   :  { %1797 = vmatpush3.bf16.msra.mxu1 %v1794_v23  ;;  %1685 = vmatprep.mubr.msk.f32.mxu1 %vm142_vm0, %v2189_v44  ;;  %v801_v44 = vadd.f32 %v2252_v37, %v705_v36  ;;  %v2404_v37 = vmax.f32 %v796_v31, 0.0 }
 0x192   :  { %1672 = vmatmul.mubr.msk.f32.vlgmr.msra.gmra.mrb[8].mxu0 %vm142_vm0, %v2229_v52 }
 0x193   :  { %1674 = vmatprep.mubr.msk.f32.mxu0 %vm142_vm0, %v2234_v53  ;;  %v815_v59 = vmax.f32 %v801_v44, 0.0 }
 0x194   :  { %1686 = vmatmul.mubr.msk.f32.vlgmr.msra.gmra.mrb[14].mxu1 %vm142_vm0, %v2229_v52 }
 0x195   :  { %1688 = vmatprep.mubr.msk.f32.mxu1 %vm142_vm0, %v2234_v53  ;;  %v2398_v53 = vpop.permute.xlu1 %714 }
 0x196   :  { %1675 = vmatmul.mubr.msk.f32.gmra.mrb[10].mxu0 %vm142_vm0, %v2243_v54 }
 0x198   :  { %1689 = vmatmul.mubr.msk.f32.gmra.mrb[16].mxu1 %vm142_vm0, %v2243_v54  ;;  %v811_v54 = vadd.f32 %v2256_v50, %v2398_v53 }
 0x19a   :  { %v817_v10 = vmax.f32 %v811_v54, 0.0 }
 0x25c   :  { %v1645_v32 = vpop.f32.mrb[4].mxu0 }
 0x25d   :  { %v890_v52 = vadd.f32 %v1645_v32, %v705_v36  ;;  %v884_v33 = vpop.f32.mrb[5].mxu0 }
 0x25e   :  { %v885_v34 = vadd.f32 %v884_v33, %v700_v35 }
 0x25f   :  { %v904_v57 = vmax.f32 %v890_v52, 0.0  ;;  %v1659_v51 = vpop.f32.mrb[10].mxu1 }
 0x260   :  { %v903_v41 = vmax.f32 %v885_v34, 0.0  ;;  %v993_v58 = vadd.f32 %v1659_v51, %v705_v36  ;;  %v987_v60 = vpop.f32.mrb[11].mxu1  ;;  %v1648_v14 = vpop.f32.mrb[6].mxu0 }
 0x261   :  { %v908_v15 = vmul.f32 %v904_v57, %v815_v59  ;;  %v988_v21 = vadd.f32 %v987_v60, %v700_v35  ;;  %v900_v61 = vadd.f32 %v1648_v14, %v2398_v53  ;;  %v894_v19 = vpop.f32.mrb[7].mxu0 }
 0x262   :  { %v907_v3 = vmul.f32 %v903_v41, %v2404_v37  ;;  %v1007_v5 = vmax.f32 %v993_v58, 0.0  ;;  %v895_v50 = vadd.f32 %v894_v19, %v2396_v38 }
 0x263   :  { %v1006_v11 = vmax.f32 %v988_v21, 0.0  ;;  %v906_v20 = vmax.f32 %v900_v61, 0.0  ;;  %v1662_v29 = vpop.f32.mrb[12].mxu1 }
 0x264   :  { %v911_v30 = vadd.f32 %v908_v15, %v907_v3  ;;  %v1011_v25 = vmul.f32 %v1007_v5, %v815_v59  ;;  %v905_v26 = vmax.f32 %v895_v50, 0.0  ;;  %v1003_v6 = vadd.f32 %v1662_v29, %v2398_v53  ;;  %v997_v18 = vpop.f32.mrb[13].mxu1 }
 0x265   :  { %v1010_v23 = vmul.f32 %v1006_v11, %v2404_v37  ;;  %v910_v44 = vmul.f32 %v906_v20, %v817_v10  ;;  %v998_v31 = vadd.f32 %v997_v18, %v2396_v38  ;;  %v1673_v32 = vpop.f32.mrb[8].mxu0 }
 0x266   :  { %v909_v52 = vmul.f32 %v905_v26, %v2409_v56  ;;  %v1009_v33 = vmax.f32 %v1003_v6, 0.0  ;;  %v1096_v34 = vadd.f32 %v1673_v32, %v705_v36  ;;  %v1090_v54 = vpop.f32.mrb[9].mxu0 }
 0x267   :  { %v1014_v62 = vadd.f32 %v1011_v25, %v1010_v23  ;;  %v1008_v57 = vmax.f32 %v998_v31, 0.0  ;;  %v1091_v51 = vadd.f32 %v1090_v54, %v700_v35  ;;  %v1687_v41 = vpop.f32.mrb[14].mxu1  ;;  %v1944_v25 = vmov 0.0  }
 0x268   :  { %v912_v58 = vadd.f32 %v911_v30, %v909_v52  ;;  %v1013_v60 = vmul.f32 %v1009_v33, %v817_v10  ;;  %v1110_v14 = vmax.f32 %v1096_v34, 0.0  ;;  %v1199_v15 = vadd.f32 %v1687_v41, %v705_v36  ;;  %v1193_v21 = vpop.f32.mrb[15].mxu1  ;;  %1715 = vmatprep.mubr.msk.f32.mxu0 %vm1943_vm7, %v1944_v25 }
 0x269   :  { %v1012_v61 = vmul.f32 %v1008_v57, %v2409_v56  ;;  %v1109_v19 = vmax.f32 %v1091_v51, 0.0  ;;  %v1194_v3 = vadd.f32 %v1193_v21, %v700_v35  ;;  %v1676_v5 = vpop.f32.mrb[10].mxu0 }
 0x26a   :  { %v913_v50 = vadd.f32 %v912_v58, %v910_v44  ;;  %v1114_v11 = vmul.f32 %v1110_v14, %v815_v59  ;;  %v1213_v20 = vmax.f32 %v1199_v15, 0.0  ;;  %v1106_v29 = vadd.f32 %v1676_v5, %v2398_v53  ;;  %v1100_v26 = vpop.f32.mrb[11].mxu0 }
 0x26b   :  { %v1015_v6 = vadd.f32 %v1014_v62, %v1012_v61  ;;  %v1113_v30 = vmul.f32 %v1109_v19, %v2404_v37  ;;  %v1212_v18 = vmax.f32 %v1194_v3, 0.0  ;;  %v1101_v36 = vadd.f32 %v1100_v26, %v2396_v38  ;;  %v1690_v23 = vpop.f32.mrb[16].mxu1 }
 0x26c   :  { %v914_v31 = vrot.slane %v913_v50, 4  ;;  %v1217_v32 = vmul.f32 %v1213_v20, %v815_v59  ;;  %v1112_v35 = vmax.f32 %v1106_v29, 0.0  ;;  %v1209_v44 = vadd.f32 %v1690_v23, %v2398_v53  ;;  %v1203_v52 = vpop.f32.mrb[17].mxu1 }
 0x26d   :  { %v1016_v33 = vadd.f32 %v1015_v6, %v1013_v60  ;;  %v1117_v34 = vadd.f32 %v1114_v11, %v1113_v30  ;;  %v1216_v54 = vmul.f32 %v1212_v18, %v2404_v37  ;;  %v1111_v57 = vmax.f32 %v1101_v36, 0.0 }
 0x26e   :  { %v915_v51 = vadd.f32 %v914_v31, %v913_v50  ;;  %v1116_v41 = vmul.f32 %v1112_v35, %v817_v10  ;;  %v1215_v62 = vmax.f32 %v1209_v44, 0.0  ;;  %v1204_v58 = vadd.f32 %v1203_v52, %v2396_v38 }
 0x26f   :  { %v1017_v14 = vrot.slane %v1016_v33, 4  ;;  %v1220_v15 = vadd.f32 %v1217_v32, %v1216_v54  ;;  %v1115_v21 = vmul.f32 %v1111_v57, %v2409_v56 }
 0x270   :  { %v916_v61 = vrot.slane %v915_v51, 2  ;;  %v1219_v59 = vmul.f32 %v1215_v62, %v817_v10  ;;  %v1214_v19 = vmax.f32 %v1204_v58, 0.0 }
 0x271   :  { %v1018_v3 = vadd.f32 %v1017_v14, %v1016_v33  ;;  %v1118_v53 = vadd.f32 %v1117_v34, %v1115_v21 }
 0x272   :  { %v917_v5 = vadd.f32 %v916_v61, %v915_v51  ;;  %v1218_v60 = vmul.f32 %v1214_v19, %v2409_v56 }
 0x273   :  { %v1019_v11 = vrot.slane %v1018_v3, 2  ;;  %v1119_v37 = vadd.f32 %v1118_v53, %v1116_v41 }
 0x274   :  { %v918_v20 = vrot.slane %v917_v5, 1  ;;  %v1221_v50 = vadd.f32 %v1220_v15, %v1218_v60 }
 0x275   :  { %v1020_v29 = vadd.f32 %v1019_v11, %v1018_v3  ;;  %v1120_v26 = vrot.slane %v1119_v37, 4 }
 0x276   :  { %v1222_v25 = vadd.f32 %v1221_v50, %v1219_v59  ;;  %v919_v38 = vadd.f32 %v918_v20, %v917_v5 }
 0x277   :  { %v1021_v6 = vrot.slane %v1020_v29, 1  ;;  %v1121_v30 = vadd.f32 %v1120_v26, %v1119_v37 }
 0x278   :  { %v1223_v18 = vrot.slane %v1222_v25, 4  ;;  %v920_v31 = vmul.f32 0.17677669, %v919_v38 }
 0x279   :  { %v1022_v36 = vadd.f32 %v1021_v6, %v1020_v29  ;;  %v1122_v23 = vrot.slane %v1121_v30, 2 }
 0x27a   :  { %v1224_v10 = vadd.f32 %v1223_v18, %v1222_v25 }
 0x27b   :  { %v1023_v32 = vmul.f32 0.17677669, %v1022_v36  ;;  %v1123_v35 = vadd.f32 %v1122_v23, %v1121_v30 }
 0x27c   :  { %v1225_v44 = vrot.slane %v1224_v10, 2 }
 0x27d   :  { %v1230_v56 = vsel %vm584_vm1, %v920_v31, %v1023_v32  ;;  %v1124_v52 = vrot.slane %v1123_v35, 1 }
 0x27e   :  { %v1226_v33 = vadd.f32 %v1225_v44, %v1224_v10 }
 0x27f   :  { %v1125_v34 = vadd.f32 %v1124_v52, %v1123_v35 }
 0x280   :  { %v1227_v54 = vrot.slane %v1226_v33, 1 }
 0x281   :  { %v1126_v57 = vmul.f32 0.17677669, %v1125_v34 }
 0x282   :  { %v1228_v51 = vadd.f32 %v1227_v54, %v1226_v33 }
 0x283   :  { %v1231_v41 = vsel %vm586_vm3, %v1230_v56, %v1126_v57 }
 0x284   :  { %v1229_v62 = vmul.f32 0.17677669, %v1228_v51 }
 0x286   :  { %v1232_v58 = vsel %vm588_vm4, %v1231_v41, %v1229_v62 }
 0x287   :  { %v1233_v14 = vsel %vm2264_vm5, %v1232_v58, -inf }
 0x288   :  { %v1234_v15 = vsel %vm591_vm6, %v1233_v14, -inf }
 0x289   :  { %v1235_v21 = vrot.slane %v1234_v15, 4 }
 0x28b   :  { %v1236_v61 = vmax.f32 %v1234_v15, %v1235_v21 }
 0x28d   :  { %v1237_v59 = vrot.slane %v1236_v61, 2 }
 0x28f   :  { %v1238_v19 = vmax.f32 %v1236_v61, %v1237_v59 }
 0x291   :  { %v1239_v3 = vrot.slane %v1238_v19, 1 }
 0x293   :  { %v1240_v53 = vmax.f32 %v1238_v19, %v1239_v3 }
 0x295   :  { %v1241_v5 = vsub.f32 %v1233_v14, %v1240_v53 }
 0x297   :  { %v1242_v60 = vmul.f32 1.442695, %v1241_v5 }
 0x299   :  { %1833 = vpow2.f32 %v1242_v60 }
 0x2a3   :  { %v1834_v11 = vpop.eup %1833 }
 0x2a4   :  { %v1244_v37 = vsel %vm2264_vm5, %v1834_v11, 0.0 }
 0x2a5   :  { %v1245_v20 = vsel %vm591_vm6, %v1244_v37, 0.0 }
 0x2a6   :  { %v1246_v50 = vrot.slane %v1245_v20, 4 }
 0x2a8   :  { %v1247_v29 = vadd.f32 %v1246_v50, %v1245_v20  ;;  %v1417_v20 = vpop.permute.xlu1 %1416 }
 0x2aa   :  { %v1248_v26 = vrot.slane %v1247_v29, 2 }
 0x2ac   :  { %v1249_v25 = vadd.f32 %v1248_v26, %v1247_v29 }
 0x2ae   :  { %v1250_v38 = vrot.slane %v1249_v25, 1 }
 0x2b0   :  { %v1251_v6 = vadd.f32 %v1250_v38, %v1249_v25 }
 0x2b2   :  { %1835 = vrcp.f32 %v1251_v6 }
 0x2bc   :  { %v1836_v30 = vpop.eup %1835 }
 0x2bd   :  { %v1253_v18 = vmul.f32 %v1836_v30, %v1244_v37 }
 0x2bf   :  { %v1261_v36 = vrot.slane %v1253_v18, %v2276_v8 }
 0x2c1   :  { %v1262_v23 = vcombine.high %v1261_v36, %v1261_v36  ;;  %v1269_v10 = vrot.slane %v1261_v36, %v2276_v8 }
 0x2c3   :  { %v1276_v31 = vrot.slane %v1262_v23, %v2276_v8  ;;  %v1277_v16 = vcombine.high %v1269_v10, %v1269_v10  ;;  %v1282_v32 = vrot.slane %v1269_v10, %v2258_v55 }
 0x2c5   :  { %v1278_v35 = vcombine.high %v1276_v31, %v1276_v31  ;;  %v1286_v44 = vrot.slane %v1276_v31, %v2258_v55  ;;  %v1290_v56 = vrot.slane %v1277_v16, %v2258_v55  ;;  %v1299_v52 = vmul.f32 %v1282_v32, %v2289_v42 }
 0x2c6   :  { %v1300_v34 = vmul.f32 %v1282_v32, %v2292_v47  ;;  %v1301_v8 = vmul.f32 %v1282_v32, %v2295_v12  ;;  %v1302_v51 = vmul.f32 %v1282_v32, %v2298_v48 }
 0x2c7   :  { %v1294_v33 = vrot.slane %v1278_v35, %v2258_v55  ;;  %v1303_v54 = vmul.f32 %v1286_v44, %v2311_v22  ;;  %v1304_v57 = vmul.f32 %v1286_v44, %v2314_v63  ;;  %v1305_v41 = vmul.f32 %v1286_v44, %v2317_v0 }
 0x2c8   :  { %v1306_v62 = vmul.f32 %v1286_v44, %v2320_v4  ;;  %v1307_v58 = vmul.f32 %v1290_v56, %v2323_v9  ;;  %v1308_v42 = vmul.f32 %v1290_v56, %v2326_v13  ;;  %v1309_v63 = vmul.f32 %v1290_v56, %v2348_v1 }
 0x2c9   :  { %v1315_v14 = vadd.f32 %v1303_v54, %v1299_v52  ;;  %v1318_v55 = vadd.f32 %v1304_v57, %v1300_v34  ;;  %v1311_v47 = vmul.f32 %v1294_v33, %v2342_v28  ;;  %v1312_v22 = vmul.f32 %v1294_v33, %v2345_v27 }
 0x2ca   :  { %v1321_v15 = vadd.f32 %v1305_v41, %v1301_v8  ;;  %v1310_v48 = vmul.f32 %v1290_v56, %v2351_v2  ;;  %v1324_v0 = vadd.f32 %v1306_v62, %v1302_v51  ;;  %v1313_v4 = vmul.f32 %v1294_v33, %v2356_v7 }
 0x2cb   :  { %v1316_v12 = vadd.f32 %v1315_v14, %v1307_v58  ;;  %v1319_v21 = vadd.f32 %v1318_v55, %v1308_v42  ;;  %v1314_v13 = vmul.f32 %v1294_v33, %v2359_v17 }
 0x2cc   :  { %v1322_v61 = vadd.f32 %v1321_v15, %v1309_v63  ;;  %v1325_v19 = vadd.f32 %v1324_v0, %v1310_v48 }
 0x2cd   :  { %v1317_v9 = vadd.f32 %v1316_v12, %v1311_v47  ;;  %v1320_v59 = vadd.f32 %v1319_v21, %v1312_v22 }
 0x2ce   :  { %v1323_v3 = vadd.f32 %v1322_v61, %v1313_v4  ;;  %v1326_v1 = vadd.f32 %v1325_v19, %v1314_v13 }
 0x2cf   :  { %v1327_v28 = vmul.f32 %v1317_v9, %v2166_v39  ;;  %v1328_v27 = vmul.f32 %v1320_v59, %v2171_v40  ;;  %v1805_v17 = vpack.c.bf16 %v1320_v59, %v1317_v9  ;;  %v1331_v40 = vld [vmem:[%s2495_s10] sm:$0xff]  ;;  %s1945_s10 = smov [#allocation9]  }
 0x2d0   :  { %v1329_v5 = vmul.f32 %v1323_v3, %v2194_v45  ;;  %v1330_v2 = vmul.f32 %v1326_v1, %v2199_v46  ;;  %v1808_v39 = vpack.c.bf16 %v1326_v1, %v1323_v3  ;;  %v1336_v45 = vpop.permute.xlu0 %1335  ;;  %s1442_s22 = sshll.u32 %s1945_s10, 4  ;;  %s1443_s22 = int_to_ptr.vmem [resolvable:$true] %s1442_s22 }
 0x2d1   :  { %v1799_v53 = vpack.c.bf16 %v1328_v27, %v1327_v28  ;;  %s1907_s4 = scalar_lea.vmem %s1443_s22, 16  ;;  %s1911_s30 = scalar_lea.vmem %s1443_s22, 32 }
 0x2d2   :  { %v1802_v7 = vpack.c.bf16 %v1330_v2, %v1329_v5  ;;  %p1908_p10 = scmp.ne.s32.totalorder %s1443_s22, %s1907_s4  ;;  %p1912_p11 = scmp.lt.s32.totalorder %s1443_s22, %s1443_s22 }
 0x2d3   :  { %1800 = vmatpush3.bf16.msra.mxu0 %v1799_v53  ;;  %p1913_p12 = scmp.lt.s32.totalorder %s1911_s30, %s1907_s4 }
 0x2d4   :  { %1801 = vmatprep.subr.bf16.mxu0 %v1942_v24 }
 0x2d5   :  { %p1914_p13 = por %p1913_p12, %p1912_p11 }
 0x2d7   :  { %1803 = vmatpush3.bf16.msra.mxu0 %v1802_v7  ;;  %p1915_p0 = pnand %p1914_p13, %p1908_p10 }
 0x2d8   :  { %1804 = vmatprep.subr.bf16.mxu0 %v1942_v24 }
 0x2db   :  { %1806 = vmatpush3.bf16.msra.mxu0 %v1805_v17 }
 0x2dc   :  { %1807 = vmatprep.subr.bf16.mxu0 %v1942_v24 }
 0x2df   :  { %1809 = vmatpush3.bf16.msra.mxu0 %v1808_v39 }
 0x2e0   :  { %1810 = vmatprep.subr.bf16.mxu0 %v1942_v24 }
 0x2e3   :  { %1812 = vmatpush3.bf16.msra.mxu0 %v2184_v43 }
 0x2e4   :  { %1813 = vmatprep.subr.bf16.mxu0 %v1942_v24 }
 0x2e7   :  { %1815 = vmatpush3.bf16.msra.mxu0 %v2212_v49  ;;  %v1427_v49 = vstv %s2498_s13 }
 0x2ea   :  { %1716 = vmatmul.mubr.msk.f32.vlgmr.msra.gmra.mrb[12].mxu0 %vm1338_vm8, %v1331_v40 }
 0x3bd   :  { %v1408_v46 = vpop.f32.mrb[12].mxu0 }
 0x3be   :  { %v1409_v60 = vadd.f32 %v1408_v46, %v1336_v45  ;;  %v1717_v11 = vpop.f32.mrb[13].mxu0 }
 0x3c0   :  { %v1412_v37 = vmax.f32 %v1409_v60, 0.0 }
 0x3c2   :  { %v1419_v50 = vmul.f32 %v1417_v20, %v1412_v37 }
 0x3c4   :  { %v1420_v29 = vrot.slane %v1419_v50, 4 }
 0x3c6   :  { %v1421_v26 = vadd.f32 %v1420_v29, %v1419_v50 }
 0x3c8   :  { %v1422_v43 = vrot.slane %v1421_v26, 2 }
 0x3ca   :  { %v1423_v25 = vadd.f32 %v1422_v43, %v1421_v26 }
 0x3cc   :  { %v1424_v24 = vrot.slane %v1423_v25, 1 }
 0x3ce   :  { %v1425_v38 = vadd.f32 %v1424_v24, %v1423_v25 }
 0x3d0   :  { %v1428_v6 = vadd.f32 %v1427_v49, %v1425_v38 }
 0x3d2   :  { %v1429_v30 = vsub.f32 0.0, %v1428_v6 }
 0x3d4   :  { %v1430_v18 = vmul.f32 1.442695, %v1429_v30 }
 0x3d6   :  { %1837 = vpow2.f32 %v1430_v18 }
 0x3e0   :  { %v1838_v36 = vpop.eup %1837 }
 0x3e1   :  { %v1432_v23 = vadd.f32 1.0, %v1838_v36 }
 0x3e3   :  { %1839 = vrcp.f32 %v1432_v23 }
 0x3ed   :  { %v1840_v10 = vpop.eup %1839 }
 0x3ee   :  { %1435 = vst [vmem:[#allocation9] sm:$0x1] %v1840_v10 }
 0x3ef   :  { %1918 = shalt.err (!%p1915_p0)
}
 0x3f0   :  { %s1919_s7 = scalar_lea.hbm %s2499_s14, 16 }
 0x3f1   :  { %p1920_p1 = scmp.ne.s32.totalorder %s2499_s14, %s1919_s7  ;;  %p1923_p2 = scmp.lt.u32.totalorder %s1919_s7, %s2499_s14 }
 0x3f3   :  { %p1925_p3 = pnand %p1923_p2, %p1920_p1 }
 0x3f5   :  { %1928 = shalt.err (!%p1925_p3)
}
 0x3f6   :  { %1445 = dma.vmem_to_hbm [thread:$0]  %s1443_s22, 16, %s2499_s14, [#allocation5]  }
 0x3f7   :  { %1933 = dma.done.wait [#allocation5], 16  }
 0x3f8   :  { %1934 = vsyncadd [#allocation5], 4294967280 }
 0x3f9   :  { %1449 = vsyncpa [#allocation4], 1 }
 0x3fa   :  { %1450 = vsyncpa [#allocation7], 1 }
 0x3fb   :  { %1451 = vsyncpa [#allocation5], 1 }

</bundles_post_ra>
